<compile_context>
chip_gen: v6e
topology: v6e:2x2x1
jax: 0.10.0
libtpu: 0.0.40
codegen_flags: <defaults>
</compile_context>

<pallas_src>
import functools
import math

import jax
import jax.numpy as jnp
from jax.experimental import pallas as pl
from jax.experimental.pallas import tpu as pltpu

NEG_INF = -1e30  # finite stand-in for torch's additive -inf mask


# ------------------------------ fused kernel --------------------------------

def _mha_flash_kernel(*refs, head_count, query_size, value_size,
                      self_regress, self_attn):
    f32, bf16 = jnp.float32, jnp.bfloat16
    H, dq, dv = head_count, query_size, value_size
    Hq, Hv = H * dq, H * dv

    if self_attn:
        (xq_ref, xkv_ref, pad_ref, wqkv_ref, bqkv_ref, wo_ref, bo_ref,
         o_ref, q_sc, m_sc, l_sc, acc_sc) = refs
    else:
        (xq_ref, kx_ref, vx_ref, pad_ref, wqkv_ref, bqkv_ref, wo_ref, bo_ref,
         o_ref, q_sc, m_sc, l_sc, acc_sc) = refs

    qi = pl.program_id(1)
    ki = pl.program_id(2)
    nk = pl.num_programs(2)
    tq = xq_ref.shape[1]

    # -- per (batch, q-tile) init: project Q once, reset online-softmax state --
    @pl.when(ki == 0)
    def _():
        xq = xq_ref[0].astype(bf16)                                    # [tq, D]
        q = jnp.dot(xq, wqkv_ref[:, :Hq],
                    preferred_element_type=f32) + bqkv_ref[:, :Hq]
        q_sc[...] = q.astype(bf16)          # 1/sqrt(dk) already folded into Wq
        m_sc[...] = jnp.full(m_sc.shape, NEG_INF, m_sc.dtype)
        l_sc[...] = jnp.zeros(l_sc.shape, l_sc.dtype)
        acc_sc[...] = jnp.zeros(acc_sc.shape, acc_sc.dtype)

    # -- K / V projection for this key tile -----------------------------------
    if self_attn:
        xkv = xkv_ref[0].astype(bf16)                                  # [tk, D]
        kv = jnp.dot(xkv, wqkv_ref[:, Hq:],
                     preferred_element_type=f32) + bqkv_ref[:, Hq:]    # [tk, Hq+Hv]
        k = kv[:, :Hq].astype(bf16)
        v = kv[:, Hq:].astype(bf16)
    else:
        kx = kx_ref[0].astype(bf16)                                    # [tk, D]
        vx = vx_ref[0].astype(bf16)
        k = (jnp.dot(kx, wqkv_ref[:, Hq:2 * Hq],
                     preferred_element_type=f32)
             + bqkv_ref[:, Hq:2 * Hq]).astype(bf16)
        v = (jnp.dot(vx, wqkv_ref[:, 2 * Hq:],
                     preferred_element_type=f32)
             + bqkv_ref[:, 2 * Hq:]).astype(bf16)
    tk = k.shape[0]

    q = q_sc[...]                                                      # [tq, Hq]

    # -- additive mask bias for this tile pair (shared by all heads) ----------
    keep = jnp.broadcast_to(pad_ref[0] <= 0.0, (tq, tk))
    if self_regress:
        row = qi * tq + jax.lax.broadcasted_iota(jnp.int32, (tq, tk), 0)
        col = ki * tk + jax.lax.broadcasted_iota(jnp.int32, (tq, tk), 1)
        keep = jnp.logical_and(keep, col <= row)
    mask_bias = jnp.where(keep, 0.0, NEG_INF).astype(f32)              # [tq, tk]

    # -- per-head online softmax + PV accumulation -----------------------------
    for h in range(H):
        qh = q[:, h * dq:(h + 1) * dq]                                 # [tq, dq]
        kh = k[:, h * dq:(h + 1) * dq]                                 # [tk, dq]
        vh = v[:, h * dv:(h + 1) * dv]                                 # [tk, dv]
        # contract last dims of both operands: no explicit K transpose
        s = jax.lax.dot_general(qh, kh, (((1,), (1,)), ((), ())),
                                preferred_element_type=f32)            # [tq, tk]
        s = s + mask_bias
        m_prev = m_sc[h]                                               # [tq, 1]
        m_new = jnp.maximum(m_prev, jnp.max(s, axis=-1, keepdims=True))
        alpha = jnp.exp(m_prev - m_new)
        p = jnp.exp(s - m_new)
        l_sc[h] = alpha * l_sc[h] + jnp.sum(p, axis=-1, keepdims=True)
        m_sc[h] = m_new
        pv = jnp.dot(p.astype(bf16), vh, preferred_element_type=f32)   # [tq, dv]
        sl = slice(h * dv, (h + 1) * dv)
        acc_sc[:, sl] = alpha * acc_sc[:, sl] + pv

    # -- finalize: normalize, then one fused output projection ----------------
    @pl.when(ki == nk - 1)
    def _():
        for h in range(H):
            sl = slice(h * dv, (h + 1) * dv)
            acc_sc[:, sl] = acc_sc[:, sl] * pl.reciprocal(l_sc[h], approx=True)
        out = jnp.dot(acc_sc[...].astype(bf16), wo_ref[...],
                      preferred_element_type=f32) + bo_ref[...]        # [tq, D]
        o_ref[0] = out.astype(o_ref.dtype)


# -------------------------------- wrapper ------------------------------------

def _pick_tile(n, target=256):
    if n <= target:
        return n
    for t in (target, 128, 64, 32, 16, 8):
        if n % t == 0:
            return t
    return n


def _vmem_limit_bytes(tq, tk, D, Hq, Hv, H, self_attn):
    bf16, f32 = 2, 4
    wtot = 2 * Hq + Hv
    act = tq * D + tk * D * (1 if self_attn else 2) + tk
    weights = (D * wtot + Hv * D) * bf16 + (wtot + D) * f32
    est = (2 * act * bf16                       # double-buffered activation tiles
           + 2 * weights                        # pinned weights (double-buffered)
           + 2 * tq * D * f32                   # output tile
           + tq * Hq * bf16 + 2 * H * tq * f32 + tq * Hv * f32      # scratch
           + 3 * tq * tk * f32 + tk * (Hq + Hv) * f32 + tq * (Hq + D) * f32)
    return int(min(64 << 20, max(32 << 20, int(1.5 * est) + (2 << 20))))


def prepare_mha_params(params, *, head_count, query_size):
    """One-time weight prep, hoisted out of the forward pass."""
    del head_count  # shapes already encode it
    scale = 1.0 / math.sqrt(query_size)
    wq = params["wq"] * scale                  # fold 1/sqrt(dk) into Q proj
    bq = params["bq"] * scale
    wqkv = jnp.concatenate([wq, params["wk"], params["wv"]],
                           axis=1).astype(jnp.bfloat16)
    bqkv = jnp.concatenate([bq, params["bk"], params["bv"]]
                           ).reshape(1, -1).astype(jnp.float32)
    wo = params["wo"].astype(jnp.bfloat16)
    bo = params["bo"].reshape(1, -1).astype(jnp.float32)
    return dict(wqkv=wqkv, bqkv=bqkv, wo=wo, bo=bo)


def multi_head_attention(prep, x, padding_mask, k_inp=None, v_inp=None, *,
                         head_count, query_size, value_size,
                         self_regress=False, enc_dec=False,
                         q_tile=256, k_tile=256):
    """Mirrors Multi_HeadAttention.forward (padding mask > 0 means masked key)."""
    self_attn = not enc_dec
    if self_attn:
        k_inp = x
        v_inp = x
    B, Sq, D = x.shape
    Sk = k_inp.shape[1]
    Hq = head_count * query_size
    Hv = head_count * value_size
    Wtot = 2 * Hq + Hv

    tq = _pick_tile(Sq, q_tile)
    tk = _pick_tile(Sk, k_tile)
    nq, nk = Sq // tq, Sk // tk

    x_b = x.astype(jnp.bfloat16)
    pad = padding_mask.astype(jnp.float32).reshape(B, 1, Sk)

    kernel = functools.partial(
        _mha_flash_kernel, head_count=head_count, query_size=query_size,
        value_size=value_size, self_regress=self_regress, self_attn=self_attn)

    q_map = lambda b, qi, ki: (b, qi, 0)
    k_map = lambda b, qi, ki: (b, ki, 0)
    pad_map = lambda b, qi, ki: (b, 0, ki)
    pin = lambda b, qi, ki: (0, 0)
    weight_specs = [
        pl.BlockSpec((D, Wtot), pin),
        pl.BlockSpec((1, Wtot), pin),
        pl.BlockSpec((Hv, D), pin),
        pl.BlockSpec((1, D), pin),
    ]

    if self_attn:
        args = (x_b, x_b, pad,
                prep["wqkv"], prep["bqkv"], prep["wo"], prep["bo"])
        in_specs = [pl.BlockSpec((1, tq, D), q_map),
                    pl.BlockSpec((1, tk, D), k_map),
                    pl.BlockSpec((1, 1, tk), pad_map)] + weight_specs
    else:
        args = (x_b, k_inp.astype(jnp.bfloat16), v_inp.astype(jnp.bfloat16), pad,
                prep["wqkv"], prep["bqkv"], prep["wo"], prep["bo"])
        in_specs = [pl.BlockSpec((1, tq, D), q_map),
                    pl.BlockSpec((1, tk, D), k_map),
                    pl.BlockSpec((1, tk, D), k_map),
                    pl.BlockSpec((1, 1, tk), pad_map)] + weight_specs

    scratch = [
        pltpu.VMEM((tq, Hq), jnp.bfloat16),             # Q tile (projected once)
        pltpu.VMEM((head_count, tq, 1), jnp.float32),   # running max per head
        pltpu.VMEM((head_count, tq, 1), jnp.float32),   # running sum per head
        pltpu.VMEM((tq, Hv), jnp.float32),              # unnormalized PV accum
    ]

    return pl.pallas_call(
        kernel,
        out_shape=jax.ShapeDtypeStruct((B, Sq, D), jnp.float32),
        grid=(B, nq, nk),
        in_specs=in_specs,
        out_specs=pl.BlockSpec((1, tq, D), q_map),
        scratch_shapes=scratch,
        compiler_params=pltpu.CompilerParams(
            dimension_semantics=("parallel", "parallel", "arbitrary"),
            vmem_limit_bytes=_vmem_limit_bytes(tq, tk, D, Hq, Hv,
                                               head_count, self_attn)),
    )(*args)


# --------------------------- pure-JAX reference ------------------------------

def mha_reference(params, x, padding_mask, k_inp=None, v_inp=None, *,
                  head_count, query_size, value_size,
                  self_regress=False, enc_dec=False):
    if not enc_dec:
        k_inp = x
        v_inp = x
    B, Sq, D = x.shape
    Sk = k_inp.shape[1]
    H, dq, dv = head_count, query_size, value_size
    q = (x @ params["wq"] + params["bq"]).reshape(B, Sq, H, dq).transpose(0, 2, 1, 3)
    k = (k_inp @ params["wk"] + params["bk"]).reshape(B, Sk, H, dq).transpose(0, 2, 1, 3)
    v = (v_inp @ params["wv"] + params["bv"]).reshape(B, Sk, H, dv).transpose(0, 2, 1, 3)
    s = jnp.einsum("bhqd,bhkd->bhqk", q, k) / math.sqrt(dq)
    keep = (padding_mask <= 0)[:, None, None, :]
    if self_regress:
        keep = jnp.logical_and(keep, jnp.tril(jnp.ones((Sq, Sk), bool))[None, None])
    s = jnp.where(keep, s, NEG_INF)
    p = jax.nn.softmax(s, axis=-1)
    o = jnp.einsum("bhqk,bhkd->bhqd", p, v)
    o = o.transpose(0, 2, 1, 3).reshape(B, Sq, H * dv)
    return o @ params["wo"] + params["bo"]


# ------------------------------ param init ----------------------------------

def _init_linear(key, din, dout, scale=0.05):
    kw, kb = jax.random.split(key)
    w = jax.random.normal(kw, (din, dout), jnp.float32) * scale
    b = jax.random.normal(kb, (dout,), jnp.float32) * scale
    return w, b


def init_mha_params(key, input_size, head_count, query_size, value_size):
    ks = jax.random.split(key, 4)
    wq, bq = _init_linear(ks[0], input_size, head_count * query_size)
    wk, bk = _init_linear(ks[1], input_size, head_count * query_size)
    wv, bv = _init_linear(ks[2], input_size, head_count * value_size)
    wo, bo = _init_linear(ks[3], head_count * value_size, input_size)
    return dict(wq=wq, bq=bq, wk=wk, bk=bk, wv=wv, bv=bv, wo=wo, bo=bo)


# --------------------------------- main --------------------------------------

if __name__ == "__main__":
    B, S, D, H = 2, 8, 32, 4
    dq = dv = D // H

    key = jax.random.PRNGKey(0)
    kp, kx, ke, kv = jax.random.split(key, 4)
    params = init_mha_params(kp, D, H, dq, dv)
    prep = prepare_mha_params(params, head_count=H, query_size=dq)

    x = jax.random.normal(kx, (B, S, D), jnp.float32)
    enc_k = jax.random.normal(ke, (B, S, D), jnp.float32)
    enc_v = jax.random.normal(kv, (B, S, D), jnp.float32)

    # padding masks: 1.0 marks a padded (masked-out) key position, 0.0 is valid
    padding_mask = jnp.zeros((B, S), jnp.float32).at[1, -1].set(1.0)
    padding_mask_enc = jnp.zeros((B, S), jnp.float32).at[1, -2:].set(1.0)

    self_fwd = jax.jit(functools.partial(
        multi_head_attention, head_count=H, query_size=dq, value_size=dv,
        self_regress=True, enc_dec=False))
    cross_fwd = jax.jit(functools.partial(
        multi_head_attention, head_count=H, query_size=dq, value_size=dv,
        self_regress=False, enc_dec=True))

    out_self = jax.block_until_ready(self_fwd(prep, x, padding_mask))
    out_cross = jax.block_until_ready(
        cross_fwd(prep, x, padding_mask_enc, enc_k, enc_v))

    ref_self = mha_reference(params, x, padding_mask, head_count=H,
                             query_size=dq, value_size=dv,
                             self_regress=True, enc_dec=False)
    ref_cross = mha_reference(params, x, padding_mask_enc, enc_k, enc_v,
                              head_count=H, query_size=dq, value_size=dv,
                              self_regress=False, enc_dec=True)

    assert out_self.shape == (B, S, D) and out_cross.shape == (B, S, D)
    assert bool(jnp.isfinite(out_self).all())
    assert bool(jnp.isfinite(out_cross).all())
    assert float(jnp.max(jnp.abs(out_self - ref_self))) < 5e-2
    assert float(jnp.max(jnp.abs(out_cross - ref_cross))) < 5e-2
    print("KERNEL_OK")
</pallas_src>

<mosaic_0001>
module attributes {stable_mosaic.version = 11 : i64} {
  func.func @_mha_flash_kernel(%arg0: i32, %arg1: i32, %arg2: i32, %arg3: memref<1x8x32xbf16, #tpu.memory_space<vmem>>, %arg4: memref<1x8x32xbf16, #tpu.memory_space<vmem>>, %arg5: memref<1x1x8xf32, #tpu.memory_space<vmem>>, %arg6: memref<32x96xbf16, #tpu.memory_space<vmem>>, %arg7: memref<1x96xf32, #tpu.memory_space<vmem>>, %arg8: memref<32x32xbf16, #tpu.memory_space<vmem>>, %arg9: memref<1x32xf32, #tpu.memory_space<vmem>>, %arg10: memref<1x8x32xf32, #tpu.memory_space<vmem>>, %arg11: memref<8x32xbf16, #tpu.memory_space<vmem>>, %arg12: memref<4x8x1xf32, #tpu.memory_space<vmem>>, %arg13: memref<4x8x1xf32, #tpu.memory_space<vmem>>, %arg14: memref<8x32xf32, #tpu.memory_space<vmem>>) attributes {dimension_semantics = [#tpu.dimension_semantics<parallel>, #tpu.dimension_semantics<parallel>, #tpu.dimension_semantics<arbitrary>], iteration_bounds = array<i64: 2, 1, 1>, scalar_prefetch = 0 : i64, scratch_operands = 4 : i64, tpu.core_type = #tpu.core_type<tc>, window_params = [{transform_indices = @transform_0, window_bounds = array<i64: 1, 8, 32>}, {transform_indices = @transform_1, window_bounds = array<i64: 1, 8, 32>}, {transform_indices = @transform_2, window_bounds = array<i64: 1, 1, 8>}, {pipeline_mode = #tpu.pipeline_mode<synchronous>, transform_indices = @transform_3, window_bounds = array<i64: 32, 96>}, {pipeline_mode = #tpu.pipeline_mode<synchronous>, transform_indices = @transform_4, window_bounds = array<i64: 1, 96>}, {pipeline_mode = #tpu.pipeline_mode<synchronous>, transform_indices = @transform_5, window_bounds = array<i64: 32, 32>}, {pipeline_mode = #tpu.pipeline_mode<synchronous>, transform_indices = @transform_6, window_bounds = array<i64: 1, 32>}, {transform_indices = @transform_7, window_bounds = array<i64: 1, 8, 32>}]} {
    %c0_i32 = arith.constant 0 : i32
    %0 = arith.cmpi eq, %arg2, %c0_i32 : i32
    %1 = arith.extui %0 : i1 to i32
    %c0_i32_0 = arith.constant 0 : i32
    %2 = arith.cmpi ne, %1, %c0_i32_0 : i32
    scf.if %2 {
      %c0_91 = arith.constant 0 : index
      %c0_92 = arith.constant 0 : index
      %c0_93 = arith.constant 0 : index
      %173 = vector.load %arg3[%c0_91, %c0_92, %c0_93] : memref<1x8x32xbf16, #tpu.memory_space<vmem>>, vector<1x8x32xbf16>
      %174 = vector.shape_cast %173 : vector<1x8x32xbf16> to vector<8x32xbf16>
      %c0_94 = arith.constant 0 : index
      %c0_95 = arith.constant 0 : index
      %175 = vector.load %arg6[%c0_94, %c0_95] : memref<32x96xbf16, #tpu.memory_space<vmem>>, vector<32x32xbf16>
      %cst_96 = arith.constant dense<0.000000e+00> : vector<8x32xf32>
      %176 = tpu.matmul %174, %175, %cst_96 {dimension_numbers = #tpu.dot_dimension_numbers<[1], [0], [0], [1], [0, 0, 1, 1], [], []>} : vector<8x32xbf16>, vector<32x32xbf16>, vector<8x32xf32> -> vector<8x32xf32>
      %c0_97 = arith.constant 0 : index
      %c0_98 = arith.constant 0 : index
      %177 = vector.load %arg7[%c0_97, %c0_98] : memref<1x96xf32, #tpu.memory_space<vmem>>, vector<1x32xf32>
      %178 = vector.broadcast %177 : vector<1x32xf32> to vector<8x32xf32>
      %179 = arith.addf %176, %178 : vector<8x32xf32>
      %180 = arith.truncf %179 : vector<8x32xf32> to vector<8x32xbf16>
      %c0_99 = arith.constant 0 : index
      %c0_100 = arith.constant 0 : index
      %181 = vector.load %arg11[%c0_99, %c0_100] : memref<8x32xbf16, #tpu.memory_space<vmem>>, vector<8x32xbf16>
      tpu.vector_store %arg11[%c0_99, %c0_100], %180 {strides = array<i32>} : memref<8x32xbf16, #tpu.memory_space<vmem>>, vector<8x32xbf16>,
      %cst_101 = arith.constant -1.000000e+30 : f32
      %182 = vector.broadcast %cst_101 : f32 to vector<4x8x1xf32>
      %c0_102 = arith.constant 0 : index
      %c0_103 = arith.constant 0 : index
      %c0_104 = arith.constant 0 : index
      %183 = vector.load %arg12[%c0_102, %c0_103, %c0_104] : memref<4x8x1xf32, #tpu.memory_space<vmem>>, vector<4x8x1xf32>
      tpu.vector_store %arg12[%c0_102, %c0_103, %c0_104], %182 {strides = array<i32>} : memref<4x8x1xf32, #tpu.memory_space<vmem>>, vector<4x8x1xf32>,
      %cst_105 = arith.constant 0.000000e+00 : f32
      %184 = vector.broadcast %cst_105 : f32 to vector<4x8x1xf32>
      %c0_106 = arith.constant 0 : index
      %c0_107 = arith.constant 0 : index
      %c0_108 = arith.constant 0 : index
      %185 = vector.load %arg13[%c0_106, %c0_107, %c0_108] : memref<4x8x1xf32, #tpu.memory_space<vmem>>, vector<4x8x1xf32>
      tpu.vector_store %arg13[%c0_106, %c0_107, %c0_108], %184 {strides = array<i32>} : memref<4x8x1xf32, #tpu.memory_space<vmem>>, vector<4x8x1xf32>,
      %cst_109 = arith.constant 0.000000e+00 : f32
      %186 = vector.broadcast %cst_109 : f32 to vector<8x32xf32>
      %c0_110 = arith.constant 0 : index
      %c0_111 = arith.constant 0 : index
      %187 = vector.load %arg14[%c0_110, %c0_111] : memref<8x32xf32, #tpu.memory_space<vmem>>, vector<8x32xf32>
      tpu.vector_store %arg14[%c0_110, %c0_111], %186 {strides = array<i32>} : memref<8x32xf32, #tpu.memory_space<vmem>>, vector<8x32xf32>,
    } else {
    }
    %c0 = arith.constant 0 : index
    %c0_1 = arith.constant 0 : index
    %c0_2 = arith.constant 0 : index
    %3 = vector.load %arg4[%c0, %c0_1, %c0_2] : memref<1x8x32xbf16, #tpu.memory_space<vmem>>, vector<1x8x32xbf16>
    %4 = vector.shape_cast %3 : vector<1x8x32xbf16> to vector<8x32xbf16>
    %c0_3 = arith.constant 0 : index
    %c32 = arith.constant 32 : index
    %5 = vector.load %arg6[%c0_3, %c32] : memref<32x96xbf16, #tpu.memory_space<vmem>>, vector<32x64xbf16>
    %cst = arith.constant dense<0.000000e+00> : vector<8x64xf32>
    %6 = tpu.matmul %4, %5, %cst {dimension_numbers = #tpu.dot_dimension_numbers<[1], [0], [0], [1], [0, 0, 1, 1], [], []>} : vector<8x32xbf16>, vector<32x64xbf16>, vector<8x64xf32> -> vector<8x64xf32>
    %c0_4 = arith.constant 0 : index
    %c32_5 = arith.constant 32 : index
    %7 = vector.load %arg7[%c0_4, %c32_5] : memref<1x96xf32, #tpu.memory_space<vmem>>, vector<1x64xf32>
    %8 = vector.broadcast %7 : vector<1x64xf32> to vector<8x64xf32>
    %9 = arith.addf %6, %8 : vector<8x64xf32>
    %10 = vector.extract_strided_slice %9 {offsets = [0, 0], sizes = [8, 32], strides = [1, 1]} : vector<8x64xf32> to vector<8x32xf32>
    %11 = arith.truncf %10 : vector<8x32xf32> to vector<8x32xbf16>
    %12 = vector.extract_strided_slice %9 {offsets = [0, 32], sizes = [8, 32], strides = [1, 1]} : vector<8x64xf32> to vector<8x32xf32>
    %13 = arith.truncf %12 : vector<8x32xf32> to vector<8x32xbf16>
    %c0_6 = arith.constant 0 : index
    %c0_7 = arith.constant 0 : index
    %14 = vector.load %arg11[%c0_6, %c0_7] : memref<8x32xbf16, #tpu.memory_space<vmem>>, vector<8x32xbf16>
    %c0_8 = arith.constant 0 : index
    %c0_9 = arith.constant 0 : index
    %c0_10 = arith.constant 0 : index
    %15 = vector.load %arg5[%c0_8, %c0_9, %c0_10] : memref<1x1x8xf32, #tpu.memory_space<vmem>>, vector<1x1x8xf32>
    %16 = vector.shape_cast %15 : vector<1x1x8xf32> to vector<1x8xf32>
    %cst_11 = arith.constant 0.000000e+00 : f32
    %17 = vector.broadcast %cst_11 : f32 to vector<1x8xf32>
    %18 = arith.cmpf ole, %16, %17 : vector<1x8xf32>
    %19 = vector.shape_cast %18 : vector<1x8xi1> to vector<1x8xi1>
    %20 = vector.broadcast %19 : vector<1x8xi1> to vector<8x8xi1>
    %c8_i32 = arith.constant 8 : i32
    %21 = arith.muli %arg1, %c8_i32 : i32
    %22 = tpu.iota {dimensions = array<i32: 0>} : vector<8x8xi32>
    %23 = vector.broadcast %21 : i32 to vector<8x8xi32>
    %24 = arith.addi %23, %22 : vector<8x8xi32>
    %c8_i32_12 = arith.constant 8 : i32
    %25 = arith.muli %arg2, %c8_i32_12 : i32
    %26 = tpu.iota {dimensions = array<i32: 1>} : vector<8x8xi32>
    %27 = vector.broadcast %25 : i32 to vector<8x8xi32>
    %28 = arith.addi %27, %26 : vector<8x8xi32>
    %29 = arith.cmpi sle, %28, %24 : vector<8x8xi32>
    %30 = arith.andi %20, %29 : vector<8x8xi1>
    %cst_13 = arith.constant 0.000000e+00 : f32
    %cst_14 = arith.constant -1.000000e+30 : f32
    %31 = vector.broadcast %cst_13 : f32 to vector<8x8xf32>
    %32 = vector.broadcast %cst_14 : f32 to vector<8x8xf32>
    %33 = arith.select %30, %31, %32 : vector<8x8xi1>, vector<8x8xf32>
    %34 = vector.extract_strided_slice %14 {offsets = [0, 0], sizes = [8, 8], strides = [1, 1]} : vector<8x32xbf16> to vector<8x8xbf16>
    %35 = vector.extract_strided_slice %11 {offsets = [0, 0], sizes = [8, 8], strides = [1, 1]} : vector<8x32xbf16> to vector<8x8xbf16>
    %36 = vector.extract_strided_slice %13 {offsets = [0, 0], sizes = [8, 8], strides = [1, 1]} : vector<8x32xbf16> to vector<8x8xbf16>
    %cst_15 = arith.constant dense<0.000000e+00> : vector<8x8xf32>
    %37 = tpu.matmul %34, %35, %cst_15 {dimension_numbers = #tpu.dot_dimension_numbers<[1], [1], [0], [0], [0, 0, 1, 0], [], []>} : vector<8x8xbf16>, vector<8x8xbf16>, vector<8x8xf32> -> vector<8x8xf32>
    %38 = arith.addf %37, %33 : vector<8x8xf32>
    %c0_16 = arith.constant 0 : index
    %c0_17 = arith.constant 0 : index
    %c0_18 = arith.constant 0 : index
    %39 = vector.load %arg12[%c0_16, %c0_17, %c0_18] : memref<4x8x1xf32, #tpu.memory_space<vmem>>, vector<1x8x1xf32>
    %40 = vector.shape_cast %39 : vector<1x8x1xf32> to vector<8x1xf32>
    %cst_19 = arith.constant dense<0xFF800000> : vector<8xf32>
    %41 = vector.multi_reduction <maximumf>, %38, %cst_19 [1] : vector<8x8xf32> to vector<8xf32>
    %42 = vector.shape_cast %41 : vector<8xf32> to vector<8x1xf32>
    %43 = arith.maximumf %40, %42 : vector<8x1xf32>
    %44 = arith.subf %40, %43 : vector<8x1xf32>
    %45 = math.exp %44 : vector<8x1xf32>
    %46 = vector.broadcast %43 : vector<8x1xf32> to vector<8x8xf32>
    %47 = arith.subf %38, %46 : vector<8x8xf32>
    %48 = math.exp %47 : vector<8x8xf32>
    %c0_20 = arith.constant 0 : index
    %c0_21 = arith.constant 0 : index
    %c0_22 = arith.constant 0 : index
    %49 = vector.load %arg13[%c0_20, %c0_21, %c0_22] : memref<4x8x1xf32, #tpu.memory_space<vmem>>, vector<1x8x1xf32>
    %50 = vector.shape_cast %49 : vector<1x8x1xf32> to vector<8x1xf32>
    %51 = arith.mulf %45, %50 : vector<8x1xf32>
    %cst_23 = arith.constant dense<0.000000e+00> : vector<8xf32>
    %52 = vector.multi_reduction <add>, %48, %cst_23 [1] : vector<8x8xf32> to vector<8xf32>
    %53 = vector.shape_cast %52 : vector<8xf32> to vector<8x1xf32>
    %54 = arith.addf %51, %53 : vector<8x1xf32>
    %c0_24 = arith.constant 0 : index
    %c0_25 = arith.constant 0 : index
    %c0_26 = arith.constant 0 : index
    %55 = vector.load %arg13[%c0_24, %c0_25, %c0_26] : memref<4x8x1xf32, #tpu.memory_space<vmem>>, vector<1x8x1xf32>
    %56 = vector.shape_cast %55 : vector<1x8x1xf32> to vector<8x1xf32>
    %57 = vector.shape_cast %54 : vector<8x1xf32> to vector<1x8x1xf32>
    tpu.vector_store %arg13[%c0_24, %c0_25, %c0_26], %57 {strides = array<i32>} : memref<4x8x1xf32, #tpu.memory_space<vmem>>, vector<1x8x1xf32>,
    %c0_27 = arith.constant 0 : index
    %c0_28 = arith.constant 0 : index
    %c0_29 = arith.constant 0 : index
    %58 = vector.load %arg12[%c0_27, %c0_28, %c0_29] : memref<4x8x1xf32, #tpu.memory_space<vmem>>, vector<1x8x1xf32>
    %59 = vector.shape_cast %58 : vector<1x8x1xf32> to vector<8x1xf32>
    %60 = vector.shape_cast %43 : vector<8x1xf32> to vector<1x8x1xf32>
    tpu.vector_store %arg12[%c0_27, %c0_28, %c0_29], %60 {strides = array<i32>} : memref<4x8x1xf32, #tpu.memory_space<vmem>>, vector<1x8x1xf32>,
    %61 = arith.truncf %48 : vector<8x8xf32> to vector<8x8xbf16>
    %cst_30 = arith.constant dense<0.000000e+00> : vector<8x8xf32>
    %62 = tpu.matmul %61, %36, %cst_30 {dimension_numbers = #tpu.dot_dimension_numbers<[1], [0], [0], [1], [0, 0, 1, 1], [], []>} : vector<8x8xbf16>, vector<8x8xbf16>, vector<8x8xf32> -> vector<8x8xf32>
    %c0_31 = arith.constant 0 : index
    %c0_32 = arith.constant 0 : index
    %63 = vector.load %arg14[%c0_31, %c0_32] : memref<8x32xf32, #tpu.memory_space<vmem>>, vector<8x8xf32>
    %64 = vector.broadcast %45 : vector<8x1xf32> to vector<8x8xf32>
    %65 = arith.mulf %64, %63 : vector<8x8xf32>
    %66 = arith.addf %65, %62 : vector<8x8xf32>
    %c0_33 = arith.constant 0 : index
    %c0_34 = arith.constant 0 : index
    %67 = vector.load %arg14[%c0_33, %c0_34] : memref<8x32xf32, #tpu.memory_space<vmem>>, vector<8x8xf32>
    tpu.vector_store %arg14[%c0_33, %c0_34], %66 {strides = array<i32>} : memref<8x32xf32, #tpu.memory_space<vmem>>, vector<8x8xf32>,
    %68 = vector.extract_strided_slice %14 {offsets = [0, 8], sizes = [8, 8], strides = [1, 1]} : vector<8x32xbf16> to vector<8x8xbf16>
    %69 = vector.extract_strided_slice %11 {offsets = [0, 8], sizes = [8, 8], strides = [1, 1]} : vector<8x32xbf16> to vector<8x8xbf16>
    %70 = vector.extract_strided_slice %13 {offsets = [0, 8], sizes = [8, 8], strides = [1, 1]} : vector<8x32xbf16> to vector<8x8xbf16>
    %cst_35 = arith.constant dense<0.000000e+00> : vector<8x8xf32>
    %71 = tpu.matmul %68, %69, %cst_35 {dimension_numbers = #tpu.dot_dimension_numbers<[1], [1], [0], [0], [0, 0, 1, 0], [], []>} : vector<8x8xbf16>, vector<8x8xbf16>, vector<8x8xf32> -> vector<8x8xf32>
    %72 = arith.addf %71, %33 : vector<8x8xf32>
    %c1 = arith.constant 1 : index
    %c0_36 = arith.constant 0 : index
    %c0_37 = arith.constant 0 : index
    %73 = vector.load %arg12[%c1, %c0_36, %c0_37] : memref<4x8x1xf32, #tpu.memory_space<vmem>>, vector<1x8x1xf32>
    %74 = vector.shape_cast %73 : vector<1x8x1xf32> to vector<8x1xf32>
    %cst_38 = arith.constant dense<0xFF800000> : vector<8xf32>
    %75 = vector.multi_reduction <maximumf>, %72, %cst_38 [1] : vector<8x8xf32> to vector<8xf32>
    %76 = vector.shape_cast %75 : vector<8xf32> to vector<8x1xf32>
    %77 = arith.maximumf %74, %76 : vector<8x1xf32>
    %78 = arith.subf %74, %77 : vector<8x1xf32>
    %79 = math.exp %78 : vector<8x1xf32>
    %80 = vector.broadcast %77 : vector<8x1xf32> to vector<8x8xf32>
    %81 = arith.subf %72, %80 : vector<8x8xf32>
    %82 = math.exp %81 : vector<8x8xf32>
    %c1_39 = arith.constant 1 : index
    %c0_40 = arith.constant 0 : index
    %c0_41 = arith.constant 0 : index
    %83 = vector.load %arg13[%c1_39, %c0_40, %c0_41] : memref<4x8x1xf32, #tpu.memory_space<vmem>>, vector<1x8x1xf32>
    %84 = vector.shape_cast %83 : vector<1x8x1xf32> to vector<8x1xf32>
    %85 = arith.mulf %79, %84 : vector<8x1xf32>
    %cst_42 = arith.constant dense<0.000000e+00> : vector<8xf32>
    %86 = vector.multi_reduction <add>, %82, %cst_42 [1] : vector<8x8xf32> to vector<8xf32>
    %87 = vector.shape_cast %86 : vector<8xf32> to vector<8x1xf32>
    %88 = arith.addf %85, %87 : vector<8x1xf32>
    %c1_43 = arith.constant 1 : index
    %c0_44 = arith.constant 0 : index
    %c0_45 = arith.constant 0 : index
    %89 = vector.load %arg13[%c1_43, %c0_44, %c0_45] : memref<4x8x1xf32, #tpu.memory_space<vmem>>, vector<1x8x1xf32>
    %90 = vector.shape_cast %89 : vector<1x8x1xf32> to vector<8x1xf32>
    %91 = vector.shape_cast %88 : vector<8x1xf32> to vector<1x8x1xf32>
    tpu.vector_store %arg13[%c1_43, %c0_44, %c0_45], %91 {strides = array<i32>} : memref<4x8x1xf32, #tpu.memory_space<vmem>>, vector<1x8x1xf32>,
    %c1_46 = arith.constant 1 : index
    %c0_47 = arith.constant 0 : index
    %c0_48 = arith.constant 0 : index
    %92 = vector.load %arg12[%c1_46, %c0_47, %c0_48] : memref<4x8x1xf32, #tpu.memory_space<vmem>>, vector<1x8x1xf32>
    %93 = vector.shape_cast %92 : vector<1x8x1xf32> to vector<8x1xf32>
    %94 = vector.shape_cast %77 : vector<8x1xf32> to vector<1x8x1xf32>
    tpu.vector_store %arg12[%c1_46, %c0_47, %c0_48], %94 {strides = array<i32>} : memref<4x8x1xf32, #tpu.memory_space<vmem>>, vector<1x8x1xf32>,
    %95 = arith.truncf %82 : vector<8x8xf32> to vector<8x8xbf16>
    %cst_49 = arith.constant dense<0.000000e+00> : vector<8x8xf32>
    %96 = tpu.matmul %95, %70, %cst_49 {dimension_numbers = #tpu.dot_dimension_numbers<[1], [0], [0], [1], [0, 0, 1, 1], [], []>} : vector<8x8xbf16>, vector<8x8xbf16>, vector<8x8xf32> -> vector<8x8xf32>
    %c0_50 = arith.constant 0 : index
    %c8 = arith.constant 8 : index
    %97 = vector.load %arg14[%c0_50, %c8] : memref<8x32xf32, #tpu.memory_space<vmem>>, vector<8x8xf32>
    %98 = vector.broadcast %79 : vector<8x1xf32> to vector<8x8xf32>
    %99 = arith.mulf %98, %97 : vector<8x8xf32>
    %100 = arith.addf %99, %96 : vector<8x8xf32>
    %c0_51 = arith.constant 0 : index
    %c8_52 = arith.constant 8 : index
    %101 = vector.load %arg14[%c0_51, %c8_52] : memref<8x32xf32, #tpu.memory_space<vmem>>, vector<8x8xf32>
    tpu.vector_store %arg14[%c0_51, %c8_52], %100 {strides = array<i32>} : memref<8x32xf32, #tpu.memory_space<vmem>>, vector<8x8xf32>,
    %102 = vector.extract_strided_slice %14 {offsets = [0, 16], sizes = [8, 8], strides = [1, 1]} : vector<8x32xbf16> to vector<8x8xbf16>
    %103 = vector.extract_strided_slice %11 {offsets = [0, 16], sizes = [8, 8], strides = [1, 1]} : vector<8x32xbf16> to vector<8x8xbf16>
    %104 = vector.extract_strided_slice %13 {offsets = [0, 16], sizes = [8, 8], strides = [1, 1]} : vector<8x32xbf16> to vector<8x8xbf16>
    %cst_53 = arith.constant dense<0.000000e+00> : vector<8x8xf32>
    %105 = tpu.matmul %102, %103, %cst_53 {dimension_numbers = #tpu.dot_dimension_numbers<[1], [1], [0], [0], [0, 0, 1, 0], [], []>} : vector<8x8xbf16>, vector<8x8xbf16>, vector<8x8xf32> -> vector<8x8xf32>
    %106 = arith.addf %105, %33 : vector<8x8xf32>
    %c2 = arith.constant 2 : index
    %c0_54 = arith.constant 0 : index
    %c0_55 = arith.constant 0 : index
    %107 = vector.load %arg12[%c2, %c0_54, %c0_55] : memref<4x8x1xf32, #tpu.memory_space<vmem>>, vector<1x8x1xf32>
    %108 = vector.shape_cast %107 : vector<1x8x1xf32> to vector<8x1xf32>
    %cst_56 = arith.constant dense<0xFF800000> : vector<8xf32>
    %109 = vector.multi_reduction <maximumf>, %106, %cst_56 [1] : vector<8x8xf32> to vector<8xf32>
    %110 = vector.shape_cast %109 : vector<8xf32> to vector<8x1xf32>
    %111 = arith.maximumf %108, %110 : vector<8x1xf32>
    %112 = arith.subf %108, %111 : vector<8x1xf32>
    %113 = math.exp %112 : vector<8x1xf32>
    %114 = vector.broadcast %111 : vector<8x1xf32> to vector<8x8xf32>
    %115 = arith.subf %106, %114 : vector<8x8xf32>
    %116 = math.exp %115 : vector<8x8xf32>
    %c2_57 = arith.constant 2 : index
    %c0_58 = arith.constant 0 : index
    %c0_59 = arith.constant 0 : index
    %117 = vector.load %arg13[%c2_57, %c0_58, %c0_59] : memref<4x8x1xf32, #tpu.memory_space<vmem>>, vector<1x8x1xf32>
    %118 = vector.shape_cast %117 : vector<1x8x1xf32> to vector<8x1xf32>
    %119 = arith.mulf %113, %118 : vector<8x1xf32>
    %cst_60 = arith.constant dense<0.000000e+00> : vector<8xf32>
    %120 = vector.multi_reduction <add>, %116, %cst_60 [1] : vector<8x8xf32> to vector<8xf32>
    %121 = vector.shape_cast %120 : vector<8xf32> to vector<8x1xf32>
    %122 = arith.addf %119, %121 : vector<8x1xf32>
    %c2_61 = arith.constant 2 : index
    %c0_62 = arith.constant 0 : index
    %c0_63 = arith.constant 0 : index
    %123 = vector.load %arg13[%c2_61, %c0_62, %c0_63] : memref<4x8x1xf32, #tpu.memory_space<vmem>>, vector<1x8x1xf32>
    %124 = vector.shape_cast %123 : vector<1x8x1xf32> to vector<8x1xf32>
    %125 = vector.shape_cast %122 : vector<8x1xf32> to vector<1x8x1xf32>
    tpu.vector_store %arg13[%c2_61, %c0_62, %c0_63], %125 {strides = array<i32>} : memref<4x8x1xf32, #tpu.memory_space<vmem>>, vector<1x8x1xf32>,
    %c2_64 = arith.constant 2 : index
    %c0_65 = arith.constant 0 : index
    %c0_66 = arith.constant 0 : index
    %126 = vector.load %arg12[%c2_64, %c0_65, %c0_66] : memref<4x8x1xf32, #tpu.memory_space<vmem>>, vector<1x8x1xf32>
    %127 = vector.shape_cast %126 : vector<1x8x1xf32> to vector<8x1xf32>
    %128 = vector.shape_cast %111 : vector<8x1xf32> to vector<1x8x1xf32>
    tpu.vector_store %arg12[%c2_64, %c0_65, %c0_66], %128 {strides = array<i32>} : memref<4x8x1xf32, #tpu.memory_space<vmem>>, vector<1x8x1xf32>,
    %129 = arith.truncf %116 : vector<8x8xf32> to vector<8x8xbf16>
    %cst_67 = arith.constant dense<0.000000e+00> : vector<8x8xf32>
    %130 = tpu.matmul %129, %104, %cst_67 {dimension_numbers = #tpu.dot_dimension_numbers<[1], [0], [0], [1], [0, 0, 1, 1], [], []>} : vector<8x8xbf16>, vector<8x8xbf16>, vector<8x8xf32> -> vector<8x8xf32>
    %c0_68 = arith.constant 0 : index
    %c16 = arith.constant 16 : index
    %131 = vector.load %arg14[%c0_68, %c16] : memref<8x32xf32, #tpu.memory_space<vmem>>, vector<8x8xf32>
    %132 = vector.broadcast %113 : vector<8x1xf32> to vector<8x8xf32>
    %133 = arith.mulf %132, %131 : vector<8x8xf32>
    %134 = arith.addf %133, %130 : vector<8x8xf32>
    %c0_69 = arith.constant 0 : index
    %c16_70 = arith.constant 16 : index
    %135 = vector.load %arg14[%c0_69, %c16_70] : memref<8x32xf32, #tpu.memory_space<vmem>>, vector<8x8xf32>
    tpu.vector_store %arg14[%c0_69, %c16_70], %134 {strides = array<i32>} : memref<8x32xf32, #tpu.memory_space<vmem>>, vector<8x8xf32>,
    %136 = vector.extract_strided_slice %14 {offsets = [0, 24], sizes = [8, 8], strides = [1, 1]} : vector<8x32xbf16> to vector<8x8xbf16>
    %137 = vector.extract_strided_slice %11 {offsets = [0, 24], sizes = [8, 8], strides = [1, 1]} : vector<8x32xbf16> to vector<8x8xbf16>
    %138 = vector.extract_strided_slice %13 {offsets = [0, 24], sizes = [8, 8], strides = [1, 1]} : vector<8x32xbf16> to vector<8x8xbf16>
    %cst_71 = arith.constant dense<0.000000e+00> : vector<8x8xf32>
    %139 = tpu.matmul %136, %137, %cst_71 {dimension_numbers = #tpu.dot_dimension_numbers<[1], [1], [0], [0], [0, 0, 1, 0], [], []>} : vector<8x8xbf16>, vector<8x8xbf16>, vector<8x8xf32> -> vector<8x8xf32>
    %140 = arith.addf %139, %33 : vector<8x8xf32>
    %c3 = arith.constant 3 : index
    %c0_72 = arith.constant 0 : index
    %c0_73 = arith.constant 0 : index
    %141 = vector.load %arg12[%c3, %c0_72, %c0_73] : memref<4x8x1xf32, #tpu.memory_space<vmem>>, vector<1x8x1xf32>
    %142 = vector.shape_cast %141 : vector<1x8x1xf32> to vector<8x1xf32>
    %cst_74 = arith.constant dense<0xFF800000> : vector<8xf32>
    %143 = vector.multi_reduction <maximumf>, %140, %cst_74 [1] : vector<8x8xf32> to vector<8xf32>
    %144 = vector.shape_cast %143 : vector<8xf32> to vector<8x1xf32>
    %145 = arith.maximumf %142, %144 : vector<8x1xf32>
    %146 = arith.subf %142, %145 : vector<8x1xf32>
    %147 = math.exp %146 : vector<8x1xf32>
    %148 = vector.broadcast %145 : vector<8x1xf32> to vector<8x8xf32>
    %149 = arith.subf %140, %148 : vector<8x8xf32>
    %150 = math.exp %149 : vector<8x8xf32>
    %c3_75 = arith.constant 3 : index
    %c0_76 = arith.constant 0 : index
    %c0_77 = arith.constant 0 : index
    %151 = vector.load %arg13[%c3_75, %c0_76, %c0_77] : memref<4x8x1xf32, #tpu.memory_space<vmem>>, vector<1x8x1xf32>
    %152 = vector.shape_cast %151 : vector<1x8x1xf32> to vector<8x1xf32>
    %153 = arith.mulf %147, %152 : vector<8x1xf32>
    %cst_78 = arith.constant dense<0.000000e+00> : vector<8xf32>
    %154 = vector.multi_reduction <add>, %150, %cst_78 [1] : vector<8x8xf32> to vector<8xf32>
    %155 = vector.shape_cast %154 : vector<8xf32> to vector<8x1xf32>
    %156 = arith.addf %153, %155 : vector<8x1xf32>
    %c3_79 = arith.constant 3 : index
    %c0_80 = arith.constant 0 : index
    %c0_81 = arith.constant 0 : index
    %157 = vector.load %arg13[%c3_79, %c0_80, %c0_81] : memref<4x8x1xf32, #tpu.memory_space<vmem>>, vector<1x8x1xf32>
    %158 = vector.shape_cast %157 : vector<1x8x1xf32> to vector<8x1xf32>
    %159 = vector.shape_cast %156 : vector<8x1xf32> to vector<1x8x1xf32>
    tpu.vector_store %arg13[%c3_79, %c0_80, %c0_81], %159 {strides = array<i32>} : memref<4x8x1xf32, #tpu.memory_space<vmem>>, vector<1x8x1xf32>,
    %c3_82 = arith.constant 3 : index
    %c0_83 = arith.constant 0 : index
    %c0_84 = arith.constant 0 : index
    %160 = vector.load %arg12[%c3_82, %c0_83, %c0_84] : memref<4x8x1xf32, #tpu.memory_space<vmem>>, vector<1x8x1xf32>
    %161 = vector.shape_cast %160 : vector<1x8x1xf32> to vector<8x1xf32>
    %162 = vector.shape_cast %145 : vector<8x1xf32> to vector<1x8x1xf32>
    tpu.vector_store %arg12[%c3_82, %c0_83, %c0_84], %162 {strides = array<i32>} : memref<4x8x1xf32, #tpu.memory_space<vmem>>, vector<1x8x1xf32>,
    %163 = arith.truncf %150 : vector<8x8xf32> to vector<8x8xbf16>
    %cst_85 = arith.constant dense<0.000000e+00> : vector<8x8xf32>
    %164 = tpu.matmul %163, %138, %cst_85 {dimension_numbers = #tpu.dot_dimension_numbers<[1], [0], [0], [1], [0, 0, 1, 1], [], []>} : vector<8x8xbf16>, vector<8x8xbf16>, vector<8x8xf32> -> vector<8x8xf32>
    %c0_86 = arith.constant 0 : index
    %c24 = arith.constant 24 : index
    %165 = vector.load %arg14[%c0_86, %c24] : memref<8x32xf32, #tpu.memory_space<vmem>>, vector<8x8xf32>
    %166 = vector.broadcast %147 : vector<8x1xf32> to vector<8x8xf32>
    %167 = arith.mulf %166, %165 : vector<8x8xf32>
    %168 = arith.addf %167, %164 : vector<8x8xf32>
    %c0_87 = arith.constant 0 : index
    %c24_88 = arith.constant 24 : index
    %169 = vector.load %arg14[%c0_87, %c24_88] : memref<8x32xf32, #tpu.memory_space<vmem>>, vector<8x8xf32>
    tpu.vector_store %arg14[%c0_87, %c24_88], %168 {strides = array<i32>} : memref<8x32xf32, #tpu.memory_space<vmem>>, vector<8x8xf32>,
    %c0_i32_89 = arith.constant 0 : i32
    %170 = arith.cmpi eq, %arg2, %c0_i32_89 : i32
    %171 = arith.extui %170 : i1 to i32
    %c0_i32_90 = arith.constant 0 : i32
    %172 = arith.cmpi ne, %171, %c0_i32_90 : i32
    scf.if %172 {
      %c0_91 = arith.constant 0 : index
      %c0_92 = arith.constant 0 : index
      %173 = vector.load %arg14[%c0_91, %c0_92] : memref<8x32xf32, #tpu.memory_space<vmem>>, vector<8x8xf32>
      %c0_93 = arith.constant 0 : index
      %c0_94 = arith.constant 0 : index
      %c0_95 = arith.constant 0 : index
      %174 = vector.load %arg13[%c0_93, %c0_94, %c0_95] : memref<4x8x1xf32, #tpu.memory_space<vmem>>, vector<1x8x1xf32>
      %175 = vector.shape_cast %174 : vector<1x8x1xf32> to vector<8x1xf32>
      %176 = tpu.reciprocal %175 {approx = true} : vector<8x1xf32> -> vector<8x1xf32>
      %177 = vector.broadcast %176 : vector<8x1xf32> to vector<8x8xf32>
      %178 = arith.mulf %173, %177 : vector<8x8xf32>
      %c0_96 = arith.constant 0 : index
      %c0_97 = arith.constant 0 : index
      %179 = vector.load %arg14[%c0_96, %c0_97] : memref<8x32xf32, #tpu.memory_space<vmem>>, vector<8x8xf32>
      tpu.vector_store %arg14[%c0_96, %c0_97], %178 {strides = array<i32>} : memref<8x32xf32, #tpu.memory_space<vmem>>, vector<8x8xf32>,
      %c0_98 = arith.constant 0 : index
      %c8_99 = arith.constant 8 : index
      %180 = vector.load %arg14[%c0_98, %c8_99] : memref<8x32xf32, #tpu.memory_space<vmem>>, vector<8x8xf32>
      %c1_100 = arith.constant 1 : index
      %c0_101 = arith.constant 0 : index
      %c0_102 = arith.constant 0 : index
      %181 = vector.load %arg13[%c1_100, %c0_101, %c0_102] : memref<4x8x1xf32, #tpu.memory_space<vmem>>, vector<1x8x1xf32>
      %182 = vector.shape_cast %181 : vector<1x8x1xf32> to vector<8x1xf32>
      %183 = tpu.reciprocal %182 {approx = true} : vector<8x1xf32> -> vector<8x1xf32>
      %184 = vector.broadcast %183 : vector<8x1xf32> to vector<8x8xf32>
      %185 = arith.mulf %180, %184 : vector<8x8xf32>
      %c0_103 = arith.constant 0 : index
      %c8_104 = arith.constant 8 : index
      %186 = vector.load %arg14[%c0_103, %c8_104] : memref<8x32xf32, #tpu.memory_space<vmem>>, vector<8x8xf32>
      tpu.vector_store %arg14[%c0_103, %c8_104], %185 {strides = array<i32>} : memref<8x32xf32, #tpu.memory_space<vmem>>, vector<8x8xf32>,
      %c0_105 = arith.constant 0 : index
      %c16_106 = arith.constant 16 : index
      %187 = vector.load %arg14[%c0_105, %c16_106] : memref<8x32xf32, #tpu.memory_space<vmem>>, vector<8x8xf32>
      %c2_107 = arith.constant 2 : index
      %c0_108 = arith.constant 0 : index
      %c0_109 = arith.constant 0 : index
      %188 = vector.load %arg13[%c2_107, %c0_108, %c0_109] : memref<4x8x1xf32, #tpu.memory_space<vmem>>, vector<1x8x1xf32>
      %189 = vector.shape_cast %188 : vector<1x8x1xf32> to vector<8x1xf32>
      %190 = tpu.reciprocal %189 {approx = true} : vector<8x1xf32> -> vector<8x1xf32>
      %191 = vector.broadcast %190 : vector<8x1xf32> to vector<8x8xf32>
      %192 = arith.mulf %187, %191 : vector<8x8xf32>
      %c0_110 = arith.constant 0 : index
      %c16_111 = arith.constant 16 : index
      %193 = vector.load %arg14[%c0_110, %c16_111] : memref<8x32xf32, #tpu.memory_space<vmem>>, vector<8x8xf32>
      tpu.vector_store %arg14[%c0_110, %c16_111], %192 {strides = array<i32>} : memref<8x32xf32, #tpu.memory_space<vmem>>, vector<8x8xf32>,
      %c0_112 = arith.constant 0 : index
      %c24_113 = arith.constant 24 : index
      %194 = vector.load %arg14[%c0_112, %c24_113] : memref<8x32xf32, #tpu.memory_space<vmem>>, vector<8x8xf32>
      %c3_114 = arith.constant 3 : index
      %c0_115 = arith.constant 0 : index
      %c0_116 = arith.constant 0 : index
      %195 = vector.load %arg13[%c3_114, %c0_115, %c0_116] : memref<4x8x1xf32, #tpu.memory_space<vmem>>, vector<1x8x1xf32>
      %196 = vector.shape_cast %195 : vector<1x8x1xf32> to vector<8x1xf32>
      %197 = tpu.reciprocal %196 {approx = true} : vector<8x1xf32> -> vector<8x1xf32>
      %198 = vector.broadcast %197 : vector<8x1xf32> to vector<8x8xf32>
      %199 = arith.mulf %194, %198 : vector<8x8xf32>
      %c0_117 = arith.constant 0 : index
      %c24_118 = arith.constant 24 : index
      %200 = vector.load %arg14[%c0_117, %c24_118] : memref<8x32xf32, #tpu.memory_space<vmem>>, vector<8x8xf32>
      tpu.vector_store %arg14[%c0_117, %c24_118], %199 {strides = array<i32>} : memref<8x32xf32, #tpu.memory_space<vmem>>, vector<8x8xf32>,
      %c0_119 = arith.constant 0 : index
      %c0_120 = arith.constant 0 : index
      %201 = vector.load %arg14[%c0_119, %c0_120] : memref<8x32xf32, #tpu.memory_space<vmem>>, vector<8x32xf32>
      %202 = arith.truncf %201 : vector<8x32xf32> to vector<8x32xbf16>
      %c0_121 = arith.constant 0 : index
      %c0_122 = arith.constant 0 : index
      %203 = vector.load %arg8[%c0_121, %c0_122] : memref<32x32xbf16, #tpu.memory_space<vmem>>, vector<32x32xbf16>
      %cst_123 = arith.constant dense<0.000000e+00> : vector<8x32xf32>
      %204 = tpu.matmul %202, %203, %cst_123 {dimension_numbers = #tpu.dot_dimension_numbers<[1], [0], [0], [1], [0, 0, 1, 1], [], []>} : vector<8x32xbf16>, vector<32x32xbf16>, vector<8x32xf32> -> vector<8x32xf32>
      %c0_124 = arith.constant 0 : index
      %c0_125 = arith.constant 0 : index
      %205 = vector.load %arg9[%c0_124, %c0_125] : memref<1x32xf32, #tpu.memory_space<vmem>>, vector<1x32xf32>
      %206 = vector.broadcast %205 : vector<1x32xf32> to vector<8x32xf32>
      %207 = arith.addf %204, %206 : vector<8x32xf32>
      %c0_126 = arith.constant 0 : index
      %c0_127 = arith.constant 0 : index
      %c0_128 = arith.constant 0 : index
      %208 = vector.load %arg10[%c0_126, %c0_127, %c0_128] : memref<1x8x32xf32, #tpu.memory_space<vmem>>, vector<1x8x32xf32>
      %209 = vector.shape_cast %208 : vector<1x8x32xf32> to vector<8x32xf32>
      %210 = vector.shape_cast %207 : vector<8x32xf32> to vector<1x8x32xf32>
      tpu.vector_store %arg10[%c0_126, %c0_127, %c0_128], %210 {strides = array<i32>} : memref<1x8x32xf32, #tpu.memory_space<vmem>>, vector<1x8x32xf32>,
    } else {
    }
    return
  }
  func.func @transform_0(%arg0: i32, %arg1: i32, %arg2: i32) -> (i32, i32, i32) {
    %c0_i32 = arith.constant 0 : i32
    %c0_i32_0 = arith.constant 0 : i32
    return %arg0, %arg1, %c0_i32 : i32, i32, i32
  }
  func.func @transform_1(%arg0: i32, %arg1: i32, %arg2: i32) -> (i32, i32, i32) {
    %c0_i32 = arith.constant 0 : i32
    %c0_i32_0 = arith.constant 0 : i32
    return %arg0, %arg2, %c0_i32 : i32, i32, i32
  }
  func.func @transform_2(%arg0: i32, %arg1: i32, %arg2: i32) -> (i32, i32, i32) {
    %c0_i32 = arith.constant 0 : i32
    %c0_i32_0 = arith.constant 0 : i32
    return %arg0, %c0_i32, %arg2 : i32, i32, i32
  }
  func.func @transform_3(%arg0: i32, %arg1: i32, %arg2: i32) -> (i32, i32) {
    %c0_i32 = arith.constant 0 : i32
    %c0_i32_0 = arith.constant 0 : i32
    %c0_i32_1 = arith.constant 0 : i32
    return %c0_i32, %c0_i32_0 : i32, i32
  }
  func.func @transform_4(%arg0: i32, %arg1: i32, %arg2: i32) -> (i32, i32) {
    %c0_i32 = arith.constant 0 : i32
    %c0_i32_0 = arith.constant 0 : i32
    %c0_i32_1 = arith.constant 0 : i32
    return %c0_i32, %c0_i32_0 : i32, i32
  }
  func.func @transform_5(%arg0: i32, %arg1: i32, %arg2: i32) -> (i32, i32) {
    %c0_i32 = arith.constant 0 : i32
    %c0_i32_0 = arith.constant 0 : i32
    %c0_i32_1 = arith.constant 0 : i32
    return %c0_i32, %c0_i32_0 : i32, i32
  }
  func.func @transform_6(%arg0: i32, %arg1: i32, %arg2: i32) -> (i32, i32) {
    %c0_i32 = arith.constant 0 : i32
    %c0_i32_0 = arith.constant 0 : i32
    %c0_i32_1 = arith.constant 0 : i32
    return %c0_i32, %c0_i32_0 : i32, i32
  }
  func.func @transform_7(%arg0: i32, %arg1: i32, %arg2: i32) -> (i32, i32, i32) {
    %c0_i32 = arith.constant 0 : i32
    %c0_i32_0 = arith.constant 0 : i32
    return %arg0, %arg1, %c0_i32 : i32, i32, i32
  }
}

</mosaic_0001>

<bundles_post_ra>
// kernel: multi_head_attention.1
= control target key start
LH: loop header
LB: loop body
LE: loop exit
PB: predicated region body
PF: predicated region fallthrough
CT: control target
= control target key end

     0   :  { %12 = vsyncpa [#allocation7], 0  ;;  %s2082_s0 = inlined_call_operand.vmem [shape: bf16[2,8,32], index: 0, kind: input, shape index: {}, may-alias: {0,1}]   ;;  %s2083_s1 = inlined_call_operand.vmem [shape: bf16[2,8,32], index: 1, kind: input, shape index: {}, may-alias: {0,1}]   ;;  %s2084_s2 = inlined_call_operand.vmem [shape: f32[2,1,8], index: 2, kind: input, shape index: {}]   ;;  %s2085_s3 = inlined_call_operand.vmem [shape: bf16[32,96], index: 3, kind: input, shape index: {}]   ;;  %s2086_s4 = inlined_call_operand.vmem [shape: f32[1,96], index: 4, kind: input, shape index: {}]   ;;  %s2087_s5 = inlined_call_operand.hbm [shape: bf16[32,32], index: 5, kind: input, shape index: {}]   ;;  %s2088_s6 = inlined_call_operand.vmem [shape: f32[1,32], index: 6, kind: input, shape index: {}]   ;;  %s2089_s7 = inlined_call_operand.hbm [shape: f32[2,8,32], index: 7, kind: output, shape index: {}]  }
   0x1   :  { %13 = vsyncpa [#allocation8], 0 }
   0x2   :  { %15 = vsyncpa [#allocation8 + $0x1], 0  ;;  %s1762_s24 = smov 0   ;;  %s1764_s25 = smov 0  }
   0x3   :  { %s1766_s26 = smov 0   ;;  %s1768_s27 = smov 0  }
   0x4   :  { %s1770_s28 = smov 0   ;;  %s1772_s29 = smov 0  }
   0x5 LB: > { %s1349_s30 = sadd.s32 4294967295, %s1702_s29   ;;  %s1350_s8 = sadd.s32 4294967294, %s1702_s29   ;;  %s1702_s29 = sphi %s1772_s29, %s21_s29   ;;  %s1698_s28 = sphi %s1770_s28, %s2098_s28   ;;  %s1694_s27 = sphi %s1768_s27, %s2097_s27   ;;  %s1690_s26 = sphi %s1766_s26, %s2096_s26   ;;  %s1686_s25 = sphi %s1764_s25, %s2095_s25   ;;  %s1682_s24 = sphi %s1762_s24, %s2094_s24  }
   0x6   : > { %s40_s9 = sadd.s32 1, %s1698_s28  ;;  %s217_s10 = sadd.s32 1, %s1690_s26 }
   0x7   : > { %p42_p0 = scmp.ge.s32.totalorder %s40_s9, 2  ;;  %p227_p1 = scmp.ne.s32.totalorder %s1690_s26, %s1686_s25 }
   0x8   : > { %p228_p2 = scmp.eq.s32.totalorder %s1349_s30, 1  ;;  %p233_p3 = scmp.ne.s32.totalorder %s1686_s25, %s1682_s24 }
   0x9   : > { %s2100_s9 = smov (%p42_p0, %s40_s9), 0  ;;  %p234_p5 = scmp.eq.s32.totalorder %s1350_s8, 1 }
   0xa   : > { %p1802_p4 = por %p228_p2, %p227_p1  ;;  %s212_s12 = ssub.s32 %s1698_s28, %s2100_s9 }
   0xb   : > { %p1351_p6 = scmp.ge.s32.totalorder %s1702_s29, 1  ;;  %p215_p7 = scmp.eq.s32.totalorder %s212_s12, 0 }
   0xc   : > { %p1809_p8 = por %p234_p5, %p233_p3  ;;  %p241_p9 = scmp.lt.s32.totalorder %s1702_s29, 3 }
   0xd   : > { %s1815_s14 = scalar_select %p215_p7, %s1690_s26, %s217_s10  }
   0xe   : > { %p1817_p10 = pnand %p1351_p6, %p241_p9  ;;  %p1821_p11 = scmp.eq.s32.totalorder %s1349_s30, 0 }
   0xf   : > { %s1704_s17 = smov [#allocation6]  }
  0x10   : > { %p1487_p12 = pneg %p1817_p10  ;;  %s259_s18 = sshll.u32 %s1704_s17, 4  ;;  %s260_s18 = int_to_ptr.vmem [resolvable:$true] %s259_s18 }
  0x11   : > { %s1607_s19 = scalar_lea.vmem %s260_s18, 256  ;;  %p1615_p5 = scmp.lt.s32.totalorder %s260_s18, %s260_s18 }
  0x12   : > { %p1488_p13 = pnand %p1821_p11, %p1487_p12  ;;  %p1608_p1 = scmp.ne.s32.totalorder %s260_s18, %s1607_s19 }
  0x13   : > { %p1616_p6 = scmp.lt.s32.totalorder %s1607_s19, %s1607_s19 }
  0x14   : > { %p1598_p0 = pneg %p1488_p13 }
  0x15   : > { %p1617_p7 = por %p1616_p6, %p1615_p5 }
  0x16   : > { %p1610_p2 = pnand %p1608_p1, %p1598_p0 }
  0x18   : > { %p1611_p3 = pneg %p1610_p2 }
  0x1a   : > { %p1618_p9 = pnand %p1617_p7, %p1611_p3 }
  0x1c   : > { %1621 = shalt.err (!%p1618_p9)
}
  0x1d   : > { %s1705_s20 = smov 64   ;;  %s1706_s21 = smov 4  }
  0x1e   : > { %1490 = dma.hbm_to_vmem [thread:$0]  (!%p1488_p13), %s2087_s5, 256, %s260_s18, [#allocation7], %s1705_s20, %s1705_s20, %s1706_s21  }
  0x1f   : > { %307 = sbr.rel (%p1817_p10) target bundleno = 1559 (0x617), region = 48 }
  0x24   : > { %1673 = dma.done.wait (%p1821_p11), [#allocation7], 256  }
  0x25   : > { %1675 = vsyncadd (%p1821_p11), [#allocation7], 4294967040  ;;  %v1707_v0 = vmov 0.0   ;;  %vm1708_vm0 = vmmov 0   ;;  %p354_p12 = scmp.lt.s32.totalorder %s1694_s27, 1  ;;  %vm403_vm1 = vcmask 261120   ;;  %v539_v38 = vlaneseq }
  0x26   : > { %1409 = vmatprep.subr.bf16.mxu0 %v1707_v0  ;;  %1413 = vmatprep.mubr.msk.bf16.mxu0 %vm1708_vm0, %v1707_v0  ;;  %459 = vst.msk [vmem:[#allocation5] sm:$0xff] %vm403_vm1, %v1707_v0  ;;  %v1565_v1 = vld [vmem:[%s2085_s3 + $0x8] sm:$0xff]   ;;  %v1566_v2 = vld [vmem:[%s2085_s3] sm:$0xff]   ;;  %s1709_s16 = smov 96   ;;  %vm448_vm2 = vcmask 257024   ;;  %s1711_s20 = smov 112  }
  0x27   : > { %1417 = vmatprep.subr.bf16.mxu1 %v1707_v0  ;;  %1421 = vmatprep.mubr.msk.bf16.mxu1 %vm1708_vm0, %v1707_v0  ;;  %s1848_s30 = scalar_select %p354_p12, %s1694_s27, 1  ;;  %v1567_v3 = vld [vmem:[%s2085_s3 + $0x8] sm:$0xff]   ;;  %v1568_v4 = vld [vmem:[%s2085_s3] sm:$0xff]   ;;  %vm557_vm3 = vcmask 64512   ;;  %v1713_v27 = vmov 0   ;;  %v540_v39 = vshrl.u32 %v539_v38, 7 }
  0x28   : > { %483 = vrot.lane.b32.xlu0 %v1565_v1, %s1709_s16  ;;  %1410 = vmatpush3.bf16.msra.mxu0 %v1567_v3  ;;  %v1363_v5 = vld [vmem:[%s2086_s4] ss:$0 sm:$0xff]  ;;  %s1712_s21 = smov 104   ;;  %v551_v42 = vand.u32 127, %v539_v38  ;;  %v1714_v43 = vmov -1e+30  }
  0x29   : > { %s1357_s19 = sshll.u32 %s1848_s30, 2  ;;  %1411 = vmatprep.subr.bf16.mxu0 %v1707_v0  ;;  %487 = vrot.lane.b32.xlu1 %v1363_v5, %s1709_s16  ;;  %s373_s8 = scalar_lea.vmem %s2084_s2, %s1848_s30  ;;  %v541_v40 = vsub.s32 0, %v540_v39  ;;  %vm450_vm8 = vcmask 7168   ;;  %vm636_vm9 = vcmask 1043456   ;;  %vm829_vm10 = vcmask 130112  }
  0x2a   : > { %s360_s12 = scalar_lea.vmem %s2082_s0, %s1357_s19  ;;  %s367_s18 = scalar_lea.vmem %s2083_s1, %s1357_s19  ;;  %v536_v26 = vld [vmem:[%s373_s8] sm:$0x1]  ;;  %1563 = vset.pattern.permute.xlu0 %v1713_v27  ;;  %1564 = vset.pattern.permute.xlu1 %v1713_v27  ;;  %vm554_vm6 = vcmp.le.s32.totalorder %v551_v42, %v540_v39  ;;  %451 = vst.msk [vmem:[#allocation3] sm:$0xff] %vm450_vm8, %v1714_v43  ;;  %452 = vst.msk [vmem:[#allocation3 + $0x8] sm:$0xff] %vm450_vm8, %v1714_v43  ;;  %vm968_vm11 = vcmask 195712   ;;  %vm1107_vm12 = vcmask 261312  }
  0x2b   : > { %v379_v6 = vld [vmem:[%s360_s12] sm:$0xf]  ;;  %s1710_s19 = smov 120   ;;  %vm537_vm4 = vcmp.le.f32.partialorder %v536_v26, 0.0  ;;  %453 = vst.msk [vmem:[#allocation3 + $0x10] sm:$0xff] %vm450_vm8, %v1714_v43  ;;  %454 = vst.msk [vmem:[#allocation3 + $0x18] sm:$0xff] %vm450_vm8, %v1714_v43 }
  0x2c   : > { %481 = vrot.lane.b32.xlu0 %v1566_v2, %s1709_s16  ;;  %1412 = vmatpush3.bf16.msra.mxu0 %v1568_v4  ;;  %v460_v9 = vld [vmem:[%s367_s18] sm:$0xf]  ;;  %v538_v28 = vsel %vm537_vm4, 1, %v1713_v27  ;;  %455 = vst.msk [vmem:[#allocation4] sm:$0xff] %vm450_vm8, %v1707_v0  ;;  %456 = vst.msk [vmem:[#allocation4 + $0x8] sm:$0xff] %vm450_vm8, %v1707_v0  ;;  %s1715_s30 = smov 88  }
  0x2d   : > { %1425 = vmatprep.subr.bf16.mxu0 %v1707_v0  ;;  %v542_v41 = vrot.slane %v538_v28, %v541_v40  ;;  %457 = vst.msk [vmem:[#allocation4 + $0x10] sm:$0xff] %vm450_vm8, %v1707_v0  ;;  %458 = vst.msk [vmem:[#allocation4 + $0x18] sm:$0xff] %vm450_vm8, %v1707_v0  ;;  %s1716_s10 = smov 80   ;;  %s1717_s12 = smov 72  }
  0x2e   : > { %s1719_s15 = smov 16   ;;  %s1720_s17 = smov 24  }
  0x2f   : > { %1414 = vmatmul.mubr.msk.bf16.vlgmr.msra.gmra.mxu0 %vm403_vm1, %v379_v6  ;;  %vm543_vm5 = vcmp.eq.s32.totalorder %v542_v41, 1  ;;  %s351_s18 = sand.u32 1, %s1686_s25   ;;  %s1381_s22 = sshll.u32 %s1694_s27, 7 }
  0x30   : > { %1427 = vmatprep.mubr.msk.bf16.mxu0 %vm1708_vm0, %v1707_v0  ;;  %vm555_vm7 = vmand %vm543_vm5, %vm554_vm6 }
  0x31   : > { %v556_v44 = vsel %vm555_vm7, 0.0, %v1714_v43  ;;  %v1940_v6 = vld [vmem:[#allocation3] sm:$0xff] }
  0x9a   : > { %v484_v7 = vpop.permute.xlu0 %483 }
  0x9b   : > { %1418 = vmatpush3.bf16.msra.mxu1 %v484_v7  ;;  %v488_v18 = vpop.permute.xlu1 %487 }
  0x9c   : > { %1419 = vmatprep.subr.bf16.mxu1 %v1707_v0 }
  0x9e   : > { %v482_v8 = vpop.permute.xlu0 %481 }
  0x9f   : > { %1420 = vmatpush3.bf16.msra.mxu1 %v482_v8 }
  0xa0   : > { %1431 = vmatprep.subr.bf16.mxu1 %v1707_v0 }
  0xa2   : > { %1422 = vmatmul.mubr.msk.bf16.vlgmr.msra.gmra.mxu1 %vm403_vm1, %v460_v9 }
  0xa3   : > { %1433 = vmatprep.mubr.msk.bf16.mxu1 %vm1708_vm0, %v1707_v0 }
  0xef   : > { %v441_v10 = vpop.f32.mrf.mxu0 }
  0xf0   : > { %v442_v11 = vadd.f32 %v1363_v5, %v441_v10  ;;  %v743_v10 = vld [vmem:[#allocation3 + $0x8] sm:$0xff] }
  0xf1   : > { %v1415_v12 = vpop.f32.mrf.mxu0 }
  0xf2   : > { %v447_v13 = vpack.c.bf16 %v442_v11, %v442_v11 }
  0xf3   : > { %v444_v14 = vpop.f32.mrf.mxu0 }
  0xf4   : > { %449 = vst.msk [vmem:[#allocation2] sm:$0xf] %vm448_vm2, %v447_v13  ;;  %v1951_v14 = vld [vmem:[#allocation3 + $0x10] sm:$0xff] }
  0xf5   : > { %v1416_v15 = vpop.f32.mrf.mxu0 }
  0xfb   : > { %v535_v16 = vld [vmem:[#allocation2] sm:$0xf] }
  0xfc   : > { %v1369_v17 = vcombine.low %v535_v16, %v535_v16 }
  0xfe   : > { %692 = vrot.lane.b32.xlu0 %v1369_v17, %s1710_s19 }
 0x102   : > { %831 = vrot.lane.b32.xlu0 %v1369_v17, %s1711_s20 }
 0x106   : > { %970 = vrot.lane.b32.xlu0 %v1369_v17, %s1712_s21 }
 0x162   : > { %v528_v19 = vpop.f32.mrf.mxu1 }
 0x163   : > { %v529_v20 = vadd.f32 %v528_v19, %v488_v18  ;;  %v1961_v18 = vld [vmem:[#allocation3 + $0x18] sm:$0xff] }
 0x164   : > { %v1423_v21 = vpop.f32.mrf.mxu1 }
 0x165   : > { %v1885_v22 = vpack.c.bf16 %v529_v20, %v529_v20 }
 0x166   : > { %v531_v23 = vpop.f32.mrf.mxu1 }
 0x167   : > { %694 = vrot.lane.b32.xlu1 %v1885_v22, %s1710_s19  ;;  %v562_v24 = vsel %vm557_vm3, %v1885_v22, 0  ;;  %s1356_s19 = sshll.u32 %s351_s18, 3 }
 0x168   : > { %v1424_v25 = vpop.f32.mrf.mxu1  ;;  %1426 = vmatpush3.bf16.xpose.msra.mxu0 %v562_v24  ;;  %s353_s23 = scalar_lea.vmem [#allocation9], %s1356_s19 }
 0x169   : > { %1437 = vmatprep.subr.bf16.mxu0 %v1707_v0  ;;  %s1236_s8 = sshll.u32 %s353_s23, 4  ;;  %s2037_s8 = int_to_ptr.vmem [resolvable:$true] %s1236_s8 }
 0x16a   : > { %s1622_s27 = scalar_lea.vmem %s2037_s8, 128 }
 0x16b   : > { %833 = vrot.lane.b32.xlu1 %v1885_v22, %s1711_s20  ;;  %p1623_p10 = scmp.ne.s32.totalorder %s2037_s8, %s1622_s27 }
 0x16d   : > { %p1624_p11 = pnand %p1623_p10, %p1802_p4 }
 0x16f   : > { %972 = vrot.lane.b32.xlu1 %v1885_v22, %s1712_s21  ;;  %1428 = vmatmul.mubr.msk.bf16.vlgmr.msra.gmra.mxu0 %vm557_vm3, %v535_v16  ;;  %p1625_p13 = pneg %p1624_p11 }
 0x170   : > { %1439 = vmatprep.mubr.msk.bf16.mxu0 %vm1708_vm0, %v1707_v0  ;;  %v693_v32 = vpop.permute.xlu0 %692 }
 0x174   : > { %v832_v35 = vpop.permute.xlu0 %831 }
 0x178   : > { %v971_v37 = vpop.permute.xlu0 %970 }
 0x1d9   : > { %v695_v29 = vpop.permute.xlu1 %694 }
 0x1da   : > { %v700_v30 = vsel %vm557_vm3, %v695_v29, 0 }
 0x1db   : > { %1438 = vmatpush3.bf16.xpose.msra.mxu0 %v700_v30 }
 0x1dc   : > { %1449 = vmatprep.subr.bf16.mxu0 %v1707_v0 }
 0x1dd   : > { %v834_v31 = vpop.permute.xlu1 %833 }
 0x1de   : > { %v839_v33 = vsel %vm557_vm3, %v834_v31, 0 }
 0x1e1   : > { %v973_v34 = vpop.permute.xlu1 %972 }
 0x1e2   : > { %1440 = vmatmul.mubr.msk.bf16.vlgmr.msra.gmra.mxu0 %vm557_vm3, %v693_v32  ;;  %v978_v36 = vsel %vm557_vm3, %v973_v34, 0 }
 0x1e3   : > { %1450 = vmatpush3.bf16.xpose.msra.mxu0 %v839_v33  ;;  %1451 = vmatprep.mubr.msk.bf16.mxu0 %vm1708_vm0, %v1707_v0 }
 0x1e4   : > { %1461 = vmatprep.subr.bf16.mxu0 %v1707_v0 }
 0x1ea   : > { %1452 = vmatmul.mubr.msk.bf16.vlgmr.msra.gmra.mxu0 %vm557_vm3, %v832_v35 }
 0x1eb   : > { %1462 = vmatpush3.bf16.xpose.msra.mxu0 %v978_v36  ;;  %1463 = vmatprep.mubr.msk.bf16.mxu0 %vm1708_vm0, %v1707_v0 }
 0x1ec   : > { %1473 = vmatprep.subr.bf16.mxu0 %v1707_v0 }
 0x1f2   : > { %1464 = vmatmul.mubr.msk.bf16.vlgmr.msra.gmra.mxu0 %vm557_vm3, %v971_v37 }
 0x1f3   : > { %1477 = vmatprep.mubr.msk.bf16.mxu0 %vm1708_vm0, %v1707_v0 }
 0x22f   : > { %v598_v45 = vpop.f32.mrf.mxu0 }
 0x230   : > { %v1915_v46 = vadd.f32 %v598_v45, %v556_v44 }
 0x231   : > { %v1429_v47 = vpop.f32.mrf.mxu0 }
 0x232   : > { %v605_v48 = vsel %vm557_vm3, %v1915_v46, -inf }
 0x233   : > { %606 = vmax.xlane.f32.xlu1 %v605_v48  ;;  %v601_v49 = vpop.f32.mrf.mxu0 }
 0x235   : > { %v1430_v50 = vpop.f32.mrf.mxu0 }
 0x2a2   : > { %v736_v51 = vpop.f32.mrf.mxu0 }
 0x2a3   : > { %v1931_v52 = vadd.f32 %v736_v51, %v556_v44 }
 0x2a4   : > { %v1441_v53 = vpop.f32.mrf.mxu0 }
 0x2a5   : > { %v744_v54 = vsel %vm557_vm3, %v1931_v52, -inf }
 0x2a6   : > { %745 = vmax.xlane.f32.xlu0 %v744_v54  ;;  %v739_v55 = vpop.f32.mrf.mxu0 }
 0x2a8   : > { %v1442_v56 = vpop.f32.mrf.mxu0 }
 0x2aa   : > { %v875_v57 = vpop.f32.mrf.mxu0 }
 0x2ab   : > { %v876_v58 = vadd.f32 %v875_v57, %v556_v44 }
 0x2ac   : > { %v1453_v59 = vpop.f32.mrf.mxu0 }
 0x2ad   : > { %v883_v60 = vsel %vm557_vm3, %v876_v58, -inf }
 0x2ae   : > { %884 = vmax.xlane.f32.xlu0 %v883_v60  ;;  %v878_v61 = vpop.f32.mrf.mxu0 }
 0x2b0   : > { %v1454_v62 = vpop.f32.mrf.mxu0 }
 0x2b1   : > { %v620_v62 = vld [vmem:[#allocation4] sm:$0xff] }
 0x2b2   : > { %v1014_v63 = vpop.f32.mrf.mxu0 }
 0x2b3   : > { %v1936_v1 = vadd.f32 %v1014_v63, %v556_v44 }
 0x2b4   : > { %v1465_v2 = vpop.f32.mrf.mxu0 }
 0x2b5   : > { %v1022_v3 = vsel %vm557_vm3, %v1936_v1, -inf }
 0x2b6   : > { %1023 = vmax.xlane.f32.xlu1 %v1022_v3  ;;  %v1017_v4 = vpop.f32.mrf.mxu0 }
 0x2b8   : > { %v1466_v5 = vpop.f32.mrf.mxu0 }
 0x2b9   : > { %v760_v5 = vld [vmem:[#allocation4 + $0x8] sm:$0xff] }
 0x2bc   : > { %v607_v7 = vpop.xlane.xlu1 %606 }
 0x2bd   : > { %v1943_v8 = vmax.f32 %v1940_v6, %v607_v7 }
 0x2bf   : > { %v609_v9 = vsub.f32 %v1940_v6, %v1943_v8  ;;  %628 = vst.msk [vmem:[#allocation3] sm:$0xff] %vm450_vm8, %v1943_v8 }
 0x2c4   : > { %614 = vperm.xlu0 %1563, %v1943_v8  }
 0x32f   : > { %v746_v11 = vpop.xlane.xlu0 %745 }
 0x330   : > { %v747_v12 = vmax.f32 %v743_v10, %v746_v11 }
 0x332   : > { %v748_v13 = vsub.f32 %v743_v10, %v747_v12  ;;  %767 = vst.msk [vmem:[#allocation3 + $0x8] sm:$0xff] %vm450_vm8, %v747_v12  ;;  %753 = vperm.xlu1 %1564, %v747_v12  }
 0x334   : > { %v749_v27 = vmul.f32 1.442695, %v748_v13 }
 0x337   : > { %v885_v15 = vpop.xlane.xlu0 %884 }
 0x338   : > { %v1954_v16 = vmax.f32 %v1951_v14, %v885_v15 }
 0x33a   : > { %v887_v17 = vsub.f32 %v1951_v14, %v1954_v16  ;;  %906 = vst.msk [vmem:[#allocation3 + $0x10] sm:$0xff] %vm450_vm8, %v1954_v16  ;;  %892 = vperm.xlu1 %1564, %v1954_v16   ;;  %v1038_v14 = vld [vmem:[#allocation4 + $0x18] sm:$0xff] }
 0x33c   : > { %v888_v54 = vmul.f32 1.442695, %v887_v17 }
 0x33e   : > { %631 = vrot.lane.b32.xlu1 %v1885_v22, %s1709_s16  ;;  %s1718_s16 = smov 8  }
 0x33f   : > { %v1024_v19 = vpop.xlane.xlu1 %1023  ;;  %v615_v23 = vpop.permute.xlu0 %614 }
 0x340   : > { %v1966_v20 = vmax.f32 %v1961_v18, %v1024_v19  ;;  %v617_v24 = vsub.f32 %v1915_v46, %v615_v23 }
 0x342   : > { %v1026_v21 = vsub.f32 %v1961_v18, %v1966_v20  ;;  %1045 = vst.msk [vmem:[#allocation3 + $0x18] sm:$0xff] %vm450_vm8, %v1966_v20  ;;  %769 = vrot.lane.b32.xlu1 %v1885_v22, %s1715_s30  ;;  %v618_v25 = vmul.f32 1.442695, %v617_v24 }
 0x344   : > { %1572 = vpow2.f32 %v618_v25 }
 0x345   : > { %1574 = vpow2.f32 %v749_v27 }
 0x346   : > { %1031 = vperm.xlu1 %1564, %v1966_v20   ;;  %v680_v20 = vld [vmem:[#allocation5] sm:$0xff] }
 0x34a   : > { %908 = vrot.lane.b32.xlu1 %v1885_v22, %s1716_s10 }
 0x34e   : > { %1047 = vrot.lane.b32.xlu1 %v1885_v22, %s1717_s12  ;;  %s2035_s12 = scalar_lea.hbm %s2089_s7, %s1381_s22 }
 0x351   : > { %v1573_v26 = vpop.eup %1572 }
 0x352   : > { %v622_v28 = vsel %vm557_vm3, %v1573_v26, 0.0  ;;  %v1978_v29 = vpop.eup %1574  ;;  %v629_v37 = vpack.c.bf16 %v1573_v26, %v1573_v26 }
 0x353   : > { %v761_v6 = vmul.f32 %v1978_v29, %v760_v5 }
 0x372   : > { %623 = vadd.xlane.f32.xlu1 %v622_v28 }
 0x383   : > { %820 = vperm.xlu1 %1564, %v1978_v29  }
 0x3ad   : > { %v754_v30 = vpop.permute.xlu1 %753 }
 0x3ae   : > { %v756_v31 = vsub.f32 %v1931_v52, %v754_v30  ;;  %v610_v52 = vmul.f32 1.442695, %v609_v9  ;;  %v899_v9 = vld [vmem:[#allocation4 + $0x10] sm:$0xff] }
 0x3b0   : > { %v757_v32 = vmul.f32 1.442695, %v756_v31 }
 0x3b2   : > { %1576 = vpow2.f32 %v757_v32 }
 0x3b5   : > { %v893_v22 = vpop.permute.xlu1 %892 }
 0x3b6   : > { %v895_v33 = vsub.f32 %v876_v58, %v893_v22  ;;  %v1027_v58 = vmul.f32 1.442695, %v1026_v21 }
 0x3b8   : > { %v896_v34 = vmul.f32 1.442695, %v895_v33 }
 0x3b9   : > { %v632_v35 = vpop.permute.xlu1 %631 }
 0x3ba   : > { %1578 = vpow2.f32 %v896_v34  ;;  %v638_v36 = vsel %vm636_vm9, %v632_v35, 0 }
 0x3bb   : > { %1432 = vmatpush3.bf16.msra.mxu1 %v638_v36 }
 0x3bc   : > { %1443 = vmatprep.subr.bf16.mxu1 %v1707_v0 }
 0x3bd   : > { %v770_v38 = vpop.permute.xlu1 %769 }
 0x3be   : > { %v775_v39 = vsel %vm636_vm9, %v770_v38, 0  ;;  %1434 = vmatmul.mubr.msk.bf16.vlgmr.msra.gmra.mxu1 %vm557_vm3, %v629_v37 }
 0x3bf   : > { %v1577_v40 = vpop.eup %1576  ;;  %1444 = vmatpush3.bf16.msra.mxu1 %v775_v39  ;;  %1445 = vmatprep.mubr.msk.bf16.mxu1 %vm1708_vm0, %v1707_v0 }
 0x3c0   : > { %v762_v41 = vsel %vm557_vm3, %v1577_v40, 0.0  ;;  %1455 = vmatprep.subr.bf16.mxu1 %v1707_v0  ;;  %v768_v45 = vpack.c.bf16 %v1577_v40, %v1577_v40 }
 0x3c1   : > { %763 = vadd.xlane.f32.xlu0 %v762_v41  ;;  %v1032_v42 = vpop.permute.xlu1 %1031 }
 0x3c2   : > { %v1034_v43 = vsub.f32 %v1936_v1, %v1032_v42 }
 0x3c4   : > { %v1035_v44 = vmul.f32 1.442695, %v1034_v43 }
 0x3c5   : > { %v909_v46 = vpop.permute.xlu1 %908 }
 0x3c6   : > { %1580 = vpow2.f32 %v1035_v44  ;;  %v914_v47 = vsel %vm636_vm9, %v909_v46, 0  ;;  %1446 = vmatmul.mubr.msk.bf16.vlgmr.msra.gmra.mxu1 %vm557_vm3, %v768_v45  ;;  %v1570_v44 = vld [vmem:[#allocation6 + $0x8] sm:$0xff]   ;;  %v1571_v45 = vld [vmem:[#allocation6] sm:$0xff]  }
 0x3c7   : > { %v1579_v48 = vpop.eup %1578  ;;  %1456 = vmatpush3.bf16.msra.mxu1 %v914_v47  ;;  %1457 = vmatprep.mubr.msk.bf16.mxu1 %vm1708_vm0, %v1707_v0  ;;  %1582 = vpow2.f32 %v610_v52 }
 0x3c8   : > { %v901_v49 = vsel %vm557_vm3, %v1579_v48, 0.0  ;;  %1467 = vmatprep.subr.bf16.mxu1 %v1707_v0  ;;  %v907_v51 = vpack.c.bf16 %v1579_v48, %v1579_v48  ;;  %1584 = vpow2.f32 %v888_v54  ;;  %1474 = vmatpush3.bf16.msra.mxu0 %v1570_v44 }
 0x3c9   : > { %902 = vadd.xlane.f32.xlu0 %v901_v49  ;;  %v1048_v50 = vpop.permute.xlu1 %1047  ;;  %1586 = vpow2.f32 %v1027_v58  ;;  %1475 = vmatprep.subr.bf16.mxu0 %v1707_v0 }
 0x3ca   : > { %v1053_v53 = vsel %vm636_vm9, %v1048_v50, 0 }
 0x3cc   : > { %1476 = vmatpush3.bf16.msra.mxu0 %v1571_v45 }
 0x3ce   : > { %1458 = vmatmul.mubr.msk.bf16.vlgmr.msra.gmra.mxu1 %vm557_vm3, %v907_v51 }
 0x3cf   : > { %1468 = vmatpush3.bf16.msra.mxu1 %v1053_v53  ;;  %1469 = vmatprep.mubr.msk.bf16.mxu1 %vm1708_vm0, %v1707_v0 }
 0x3d3   : > { %v1581_v55 = vpop.eup %1580 }
 0x3d4   : > { %v1040_v56 = vsel %vm557_vm3, %v1581_v55, 0.0  ;;  %v1046_v57 = vpack.c.bf16 %v1581_v55, %v1581_v55  ;;  %v1583_v59 = vpop.eup %1582 }
 0x3d5   : > { %1041 = vadd.xlane.f32.xlu1 %v1040_v56  ;;  %v1585_v60 = vpop.eup %1584  ;;  %v621_v63 = vmul.f32 %v1583_v59, %v620_v62 }
 0x3d6   : > { %1470 = vmatmul.mubr.msk.bf16.vlgmr.msra.gmra.mxu1 %vm557_vm3, %v1046_v57  ;;  %v1587_v61 = vpop.eup %1586  ;;  %v900_v10 = vmul.f32 %v1585_v60, %v899_v9 }
 0x3d7   : > { %v1039_v16 = vmul.f32 %v1587_v61, %v1038_v14 }
 0x3df   : > { %683 = vperm.xlu0 %1563, %v1583_v59  }
 0x3e3   : > { %959 = vperm.xlu0 %1563, %v1585_v60  }
 0x3e7   : > { %1098 = vperm.xlu0 %1563, %v1587_v61  }
 0x3fb   : > { %v624_v1 = vpop.xlane.xlu1 %623 }
 0x3fc   : > { %v625_v2 = vadd.f32 %v624_v1, %v621_v63 }
 0x3fe   : > { %627 = vst.msk [vmem:[#allocation4] sm:$0xff] %vm450_vm8, %v625_v2 }
 0x3ff   : > { %v821_v13 = vpop.permute.xlu1 %820 }
 0x405   : > { %v1113_v3 = vld [vmem:[#allocation4] sm:$0xff] }
 0x406   : > { %1588 = vrcp.f32 %v1113_v3 }
 0x413   : > { %v1589_v4 = vpop.eup %1588 }
 0x414   : > { %1117 = vperm.xlu0 %1563, %v1589_v4  }
 0x44a   : > { %v764_v7 = vpop.xlane.xlu0 %763 }
 0x44b   : > { %v765_v8 = vadd.f32 %v764_v7, %v761_v6 }
 0x44d   : > { %766 = vst.msk [vmem:[#allocation4 + $0x8] sm:$0xff] %vm450_vm8, %v765_v8 }
 0x452   : > { %v903_v11 = vpop.xlane.xlu0 %902 }
 0x453   : > { %v904_v12 = vadd.f32 %v903_v11, %v900_v10  ;;  %v1376_v10 = vld [vmem:[%s2088_s6] ss:$0 sm:$0xff] }
 0x454   : > { %v1123_v32 = vld [vmem:[#allocation4 + $0x8] sm:$0xff] }
 0x455   : > { %905 = vst.msk [vmem:[#allocation4 + $0x10] sm:$0xff] %vm450_vm8, %v904_v12 }
 0x45a   : > { %v684_v21 = vpop.permute.xlu0 %683 }
 0x45b   : > { %v686_v23 = vmul.f32 %v684_v21, %v680_v20 }
 0x45c   : > { %v1133_v15 = vld [vmem:[#allocation4 + $0x10] sm:$0xff] }
 0x45d   : > { %1590 = vrcp.f32 %v1133_v15 }
 0x45e   : > { %v1042_v17 = vpop.xlane.xlu1 %1041  ;;  %1592 = vrcp.f32 %v1123_v32  ;;  %v960_v50 = vpop.permute.xlu0 %959 }
 0x45f   : > { %v1043_v18 = vadd.f32 %v1042_v17, %v1039_v16 }
 0x461   : > { %1044 = vst.msk [vmem:[#allocation4 + $0x18] sm:$0xff] %vm450_vm8, %v1043_v18 }
 0x462   : > { %v1099_v55 = vpop.permute.xlu0 %1098 }
 0x468   : > { %v1143_v34 = vld [vmem:[#allocation4 + $0x18] sm:$0xff] }
 0x469   : > { %1594 = vrcp.f32 %v1143_v34 }
 0x46a   : > { %v1591_v19 = vpop.eup %1590 }
 0x46b   : > { %1137 = vperm.xlu0 %1563, %v1591_v19   ;;  %v1593_v40 = vpop.eup %1592 }
 0x476   : > { %v1595_v43 = vpop.eup %1594 }
 0x47e   : > { %v674_v24 = vpop.f32.mrf.mxu1 }
 0x47f   : > { %v687_v25 = vadd.f32 %v686_v23, %v674_v24 }
 0x480   : > { %v1435_v26 = vpop.f32.mrf.mxu1 }
 0x481   : > { %688 = vst.msk [vmem:[#allocation5] sm:$0xff] %vm557_vm3, %v687_v25 }
 0x482   : > { %v677_v27 = vpop.f32.mrf.mxu1 }
 0x484   : > { %v1436_v28 = vpop.f32.mrf.mxu1 }
 0x486   : > { %v811_v29 = vpop.f32.mrf.mxu1 }
 0x487   : > { %825 = vrot.lane.b32.xlu1 %v811_v29, %s1718_s16  ;;  %s1222_s16 = scalar_lea.sflag [#allocation8], %s351_s18 }
 0x488   : > { %v1447_v30 = vpop.f32.mrf.mxu1  ;;  %v817_v46 = vld [vmem:[#allocation5] sm:$0xff] }
 0x489   : > { %v823_v47 = vmul.f32 %v821_v13, %v817_v46 }
 0x48a   : > { %v814_v31 = vpop.f32.mrf.mxu1 }
 0x48c   : > { %v1448_v22 = vpop.f32.mrf.mxu1 }
 0x48e   : > { %v950_v33 = vpop.f32.mrf.mxu1 }
 0x48f   : > { %964 = vrot.lane.b32.xlu1 %v950_v33, %s1719_s15  ;;  %v1118_v59 = vpop.permute.xlu0 %1117  ;;  %s1721_s15 = smov [#allocation9]  }
 0x490   : > { %v1459_v35 = vpop.f32.mrf.mxu1 }
 0x492   : > { %v953_v36 = vpop.f32.mrf.mxu1 }
 0x494   : > { %v1460_v37 = vpop.f32.mrf.mxu1 }
 0x496   : > { %v1089_v38 = vpop.f32.mrf.mxu1 }
 0x497   : > { %1103 = vrot.lane.b32.xlu1 %v1089_v38, %s1720_s17  ;;  %s1626_s17 = sshll.u32 %s1721_s15, 4  ;;  %s1627_s17 = int_to_ptr.vmem [resolvable:$false] %s1626_s17 }
 0x498   : > { %v1471_v39 = vpop.f32.mrf.mxu1  ;;  %s1628_s19 = scalar_lea.vmem %s1627_s17, 256  ;;  %p1629_p0 = scmp.lt.s32.totalorder %s2037_s8, %s1627_s17 }
 0x499   : > { %p1630_p1 = scmp.lt.s32.totalorder %s1628_s19, %s1622_s27 }
 0x49a   : > { %v1092_v41 = vpop.f32.mrf.mxu1 }
 0x49b   : > { %1127 = vperm.xlu1 %1564, %v1593_v40   ;;  %p1631_p2 = por %p1630_p1, %p1629_p0 }
 0x49c   : > { %v1472_v42 = vpop.f32.mrf.mxu1 }
 0x49d   : > { %p1632_p3 = pnand %p1631_p2, %p1625_p13 }
 0x49f   : > { %1147 = vperm.xlu1 %1564, %v1595_v43  }
 0x4e6   : > { %v1138_v2 = vpop.permute.xlu0 %1137 }
 0x4f9   : > { %v826_v48 = vpop.permute.xlu1 %825 }
 0x4fa   : > { %v828_v49 = vadd.f32 %v826_v48, %v823_v47 }
 0x4fc   : > { %830 = vst.msk [vmem:[#allocation5] sm:$0xff] %vm829_vm10, %v828_v49 }
 0x501   : > { %v965_v53 = vpop.permute.xlu1 %964 }
 0x503   : > { %v956_v51 = vld [vmem:[#allocation5] sm:$0xff] }
 0x504   : > { %v962_v52 = vmul.f32 %v960_v50, %v956_v51 }
 0x506   : > { %v967_v54 = vadd.f32 %v965_v53, %v962_v52 }
 0x508   : > { %969 = vst.msk [vmem:[#allocation5] sm:$0xff] %vm968_vm11, %v967_v54 }
 0x509   : > { %v1104_v0 = vpop.permute.xlu1 %1103 }
 0x50f   : > { %v1095_v56 = vld [vmem:[#allocation5] sm:$0xff] }
 0x510   : > { %v1101_v57 = vmul.f32 %v1099_v55, %v1095_v56 }
 0x512   : > { %v1106_v58 = vadd.f32 %v1104_v0, %v1101_v57 }
 0x514   : > { %1108 = vst.msk [vmem:[#allocation5] sm:$0xff] %vm1107_vm12, %v1106_v58 }
 0x516   : > { %v1128_v63 = vpop.permute.xlu1 %1127 }
 0x51a   : > { %v1148_v6 = vpop.permute.xlu1 %1147 }
 0x51b   : > { %v1112_v60 = vld [vmem:[#allocation5] sm:$0xff] }
 0x51c   : > { %v1120_v61 = vmul.f32 %v1118_v59, %v1112_v60 }
 0x51e   : > { %1121 = vst.msk [vmem:[#allocation5] sm:$0xff] %vm557_vm3, %v1120_v61 }
 0x525   : > { %v1122_v62 = vld [vmem:[#allocation5] sm:$0xff] }
 0x526   : > { %v1130_v1 = vmul.f32 %v1128_v63, %v1122_v62 }
 0x528   : > { %1131 = vst.msk [vmem:[#allocation5] sm:$0xff] %vm829_vm10, %v1130_v1 }
 0x52f   : > { %v1132_v3 = vld [vmem:[#allocation5] sm:$0xff] }
 0x530   : > { %v1140_v4 = vmul.f32 %v1138_v2, %v1132_v3 }
 0x532   : > { %1141 = vst.msk [vmem:[#allocation5] sm:$0xff] %vm968_vm11, %v1140_v4 }
 0x539   : > { %v1142_v5 = vld [vmem:[#allocation5] sm:$0xff] }
 0x53a   : > { %v1150_v7 = vmul.f32 %v1148_v6, %v1142_v5 }
 0x53c   : > { %1151 = vst.msk [vmem:[#allocation5] sm:$0xff] %vm1107_vm12, %v1150_v7 }
 0x543   : > { %v1152_v8 = vld [vmem:[#allocation5] sm:$0xff] }
 0x544   : > { %v1153_v9 = vpack.c.bf16 %v1152_v8, %v1152_v8 }
 0x546   : > { %1478 = vmatmul.mubr.msk.bf16.vlgmr.msra.gmra.mxu0 %vm403_vm1, %v1153_v9 }
 0x606   : > { %v1214_v11 = vpop.f32.mrf.mxu0 }
 0x607   : > { %v1215_v12 = vadd.f32 %v1376_v10, %v1214_v11 }
 0x608   : > { %v1479_v13 = vpop.f32.mrf.mxu0 }
 0x609   : > { %1220 = vst.msk [vmem:[%s353_s23] sm:$0xff] %vm403_vm1, %v1215_v12 }
 0x60a   : > { %v1217_v14 = vpop.f32.mrf.mxu0 }
 0x60b   : > { %1635 = shalt.err (!%p1632_p3)
}
 0x60c   : > { %s1636_s20 = scalar_lea.hbm %s2035_s12, 128  ;;  %s1640_s22 = scalar_lea.hbm %s2089_s7, 256 }
 0x60d   : > { %p1637_p5 = scmp.ne.s32.totalorder %s2035_s12, %s1636_s20  ;;  %p1641_p9 = scmp.lt.s32.totalorder %s2035_s12, %s2089_s7 }
 0x60e   : > { %p1642_p12 = scmp.lt.s32.totalorder %s1640_s22, %s1636_s20 }
 0x60f   : > { %p1638_p6 = pnand %p1637_p5, %p1802_p4 }
 0x610   : > { %p1643_p10 = por %p1642_p12, %p1641_p9 }
 0x611   : > { %p1639_p7 = pneg %p1638_p6 }
 0x613   : > { %p1644_p11 = pnand %p1643_p10, %p1639_p7 }
 0x615   : > { %1647 = shalt.err (!%p1644_p11)
}
 0x616   : > { %1485 = dma.vmem_to_hbm [thread:$0]  (%p1802_p4), %s2037_s8, 128, %s2035_s12, %s1222_s16   ;;  %v1480_v15 = vpop.f32.mrf.mxu0 }
 0x617 PF: > { %p1497_p13 = scmp.ge.s32.totalorder %s1702_s29, 2  ;;  %s1248_s10 = sand.u32 1, %s1682_s24  }
 0x618   : > { %s1249_s27 = scalar_lea.sflag [#allocation8], %s1248_s10 }
 0x619   : > { %p1492_p0 = pnand %p1497_p13, %p1809_p8 }
 0x61b   : > { %p1493_p1 = pneg %p1492_p0 }
 0x61d   : > { %1677 = dma.done.wait (%p1493_p1), %s1249_s27, 128  }
 0x61e   : > { %1679 = vsyncadd (%p1493_p1), %s1249_s27, 4294967168  ;;  %s21_s29 = sadd.s32 1, %s1702_s29   ;;  %s2094_s24 = smov %s1686_s25 }
 0x61f   : > { %p18_p2 = scmp.ge.s32.totalorder %s21_s29, 4   ;;  %s2095_s25 = smov %s1690_s26 }
 0x620   : > { %s2096_s26 = smov %s1815_s14  ;;  %s2097_s27 = smov %s1698_s28 }
 0x621   : > { %s2098_s28 = smov %s2100_s9  ;;  %20 = sbr.rel (!%p18_p2) target bundleno = 5 (0x5), region = 108 }
 0x626   :  { %1254 = vsyncpa [#allocation7], 1 }
 0x627   :  { %1256 = vsyncpa [#allocation7 + $0x1], 1 }
 0x628   :  { %1257 = vsyncpa [#allocation8], 1 }
 0x629   :  { %1259 = vsyncpa [#allocation8 + $0x1], 1 }

</bundles_post_ra>
